<compile_context>
chip_gen: v7x
topology: tpu7x:2x2x1
jax: 0.10.0
libtpu: 0.0.40
codegen_flags: <defaults>
</compile_context>

<pallas_src>
import functools

import jax
import jax.numpy as jnp
import numpy as np
from jax import lax
from jax.experimental import pallas as pl
from jax.experimental.pallas import tpu as pltpu


def _round_up(v, m):
    return (v + m - 1) // m * m


# ----------------------------------------------------------------------------
# W-direction shift for one kw tap:  out[..., w, :] = x[..., w + kw - 1, :]
# with zeros outside the image (the conv's W padding).
# ----------------------------------------------------------------------------
def _shift_w(x, kw):
    W = x.shape[-2]
    if kw == 1:
        return x
    if W % 8 == 0 and W >= 8:
        # Rotation runs on the XLU (idle slot here); only the wrapped edge
        # column needs a VPU select.
        shift = 1 if kw == 0 else W - 1
        rolled = pltpu.roll(x, shift=shift, axis=x.ndim - 2)
        col = lax.broadcasted_iota(jnp.int32, x.shape, x.ndim - 2)
        edge = 0 if kw == 0 else W - 1
        return jnp.where(col == edge, jnp.array(0, rolled.dtype), rolled)
    # Fallback for W not a multiple of 8: explicit zero column + slice.
    zero_col = jnp.zeros(x.shape[:-2] + (1,) + x.shape[-1:], x.dtype)
    if kw == 0:
        return jnp.concatenate([zero_col, x[..., : W - 1, :]], axis=-2)
    return jnp.concatenate([x[..., 1:, :], zero_col], axis=-2)


# ----------------------------------------------------------------------------
# Fused kernel: depthwise 3x3 (+BN bias+ReLU) -> pointwise 1x1 (+BN+ReLU)
# ----------------------------------------------------------------------------
def _fused_block_kernel(x_ref, xtop_ref, xbot_ref, w1_ref, b1_ref, w2_ref,
                        s2_ref, b2_ref, o_ref, acc_ref):
    # x_ref:    (1, TH, W, Cin)  unpadded image rows [h*TH, h*TH+TH)
    # xtop_ref: (1, 1,  W, Cin)  image row max(h*TH-1, 0)   (used iff h > 0)
    # xbot_ref: (1, 1,  W, Cin)  image row min(h*TH+TH, H-1)(used iff not last)
    # w1_ref:   (3, 3, Cin)      depthwise weights * BN1 scale   (compute dtype)
    # b1_ref:   (1, Cin)         BN1 folded bias                 (compute dtype)
    # w2_ref:   (Cin, Cout)      pointwise weights               (compute dtype)
    # s2_ref:   (1, Cout)        BN2 scale (f32, applied after the matmul)
    # b2_ref:   (1, Cout)        BN2 folded bias (f32)
    # o_ref:    (1, TH, W, Cout) output tile (f32)
    # acc_ref:  (TH, W, Cin)     VMEM scratch accumulator (compute dtype)
    TH, W, Cout = o_ref.shape[1], o_ref.shape[2], o_ref.shape[3]
    Cin = x_ref.shape[3]
    cdt = w1_ref.dtype
    h = pl.program_id(1)
    n_h = pl.num_programs(1)

    w1 = w1_ref[...]                                  # (3, 3, Cin)

    # One W-shifted copy of the body rows per kw tap (shift in the dtype the
    # data arrives in, cast once); shared by all three kh taps below.
    body = x_ref[0]                                   # (TH, W, Cin)
    bs = [_shift_w(body, kw).astype(cdt) for kw in range(3)]

    # kh == 1 (center row): full coverage -> initializes the accumulator
    # directly (no zero fill + add).
    acc_ref[...] = bs[0] * w1[1, 0] + bs[1] * w1[1, 1] + bs[2] * w1[1, 2]

    if TH > 1:
        # kh == 0 from the body: output rows 1..TH-1 read body rows 0..TH-2.
        acc_ref[1:TH, :, :] += (bs[0][:TH - 1] * w1[0, 0] +
                                bs[1][:TH - 1] * w1[0, 1] +
                                bs[2][:TH - 1] * w1[0, 2])
        # kh == 2 from the body: output rows 0..TH-2 read body rows 1..TH-1.
        acc_ref[0:TH - 1, :, :] += (bs[0][1:] * w1[2, 0] +
                                    bs[1][1:] * w1[2, 1] +
                                    bs[2][1:] * w1[2, 2])

    # kh == 0 for output row 0 comes from the top halo row; at the image top
    # (h == 0) the padding is zero, so skip the taps entirely.
    @pl.when(h > 0)
    def _():
        top = xtop_ref[0]                             # (1, W, Cin)
        ts = [_shift_w(top, kw).astype(cdt) for kw in range(3)]
        acc_ref[0:1, :, :] += ts[0] * w1[0, 0] + ts[1] * w1[0, 1] + ts[2] * w1[0, 2]

    # kh == 2 for output row TH-1 comes from the bottom halo row.
    @pl.when(h < n_h - 1)
    def _():
        bot = xbot_ref[0]                             # (1, W, Cin)
        bsh = [_shift_w(bot, kw).astype(cdt) for kw in range(3)]
        acc_ref[TH - 1:TH, :, :] += (bsh[0] * w1[2, 0] + bsh[1] * w1[2, 1] +
                                     bsh[2] * w1[2, 2])

    # BN1 bias + ReLU, then the 1x1 conv as a channel matmul.  The depthwise
    # activation never leaves VMEM.  BN2 scale/bias + ReLU run in f32 on the
    # f32-accumulated matmul result (scale never quantized to bf16).
    y1 = jnp.maximum(acc_ref[...] + b1_ref[...], 0).astype(w2_ref.dtype)
    y1 = y1.reshape(TH * W, Cin)
    z = jnp.dot(y1, w2_ref[...], preferred_element_type=jnp.float32)
    z = jnp.maximum(z * s2_ref[...] + b2_ref[...], 0.0)
    o_ref[...] = z.reshape(1, TH, W, Cout).astype(o_ref.dtype)


# ----------------------------------------------------------------------------
# Row-tile chooser: biggest TH dividing H whose *real* VMEM footprint (lane
# padding, double-buffered streams, temporaries, resident weights) fits the
# budget, preferring grids with >= min_steps (and even) steps.
# ----------------------------------------------------------------------------
def _choose_row_tile(N, H, W, Cin, Cout, in_bytes, cd_bytes,
                     *, budget_bytes=8 << 20, min_steps=4):
    Wp = _round_up(W, 8)
    Cin_l = _round_up(Cin, 128)
    Cout_l = _round_up(Cout, 128)

    # Resident weights / biases (counted twice: conservative double-buffer).
    w_bytes = 2 * (3 * 8 * Cin_l * cd_bytes            # w1 (3, 3, Cin)
                   + 8 * Cin_l * cd_bytes              # b1
                   + _round_up(Cin, 8) * Cout_l * cd_bytes   # w2
                   + 2 * 8 * Cout_l * 4)               # s2, b2

    def footprint(th):
        body_in = th * Wp * Cin_l * in_bytes
        halo_in = 2 * Wp * Cin_l * in_bytes
        out_blk = th * Wp * Cout_l * 4
        pipe = 2 * (body_in + halo_in + out_blk)       # double-buffered DMA
        acc = th * Wp * Cin_l * cd_bytes               # scratch accumulator
        temps = (3 * th * Wp * Cin_l * cd_bytes        # body + 2 shifted copies
                 + th * Wp * Cin_l * cd_bytes          # y1 matmul operand
                 + 2 * th * Wp * Cout_l * 4)           # z + epilogue temps
        return pipe + acc + temps + w_bytes

    divisors = [d for d in range(1, H + 1) if H % d == 0]
    fitting = [d for d in divisors if footprint(d) <= budget_bytes]
    if not fitting:
        fitting = [min(divisors)]

    def steps(d):
        return N * (H // d)

    best = [d for d in fitting if steps(d) >= min_steps and steps(d) % 2 == 0]
    if not best:
        best = [d for d in fitting if steps(d) >= min_steps]
    if not best:
        # Tiny problem: pipelining / megacore overlap is moot anyway.
        best = fitting
    return max(best)


# ----------------------------------------------------------------------------
# NHWC wrapper: zero wrapper-side HBM glue (no pad, no relayout).
# ----------------------------------------------------------------------------
def block_forward_nhwc(x_nhwc, params, *, stride=1, eps=1e-5,
                       compute_dtype=jnp.bfloat16):
    """MobileNet Block forward (eval-mode BN), NHWC in / NHWC out (f32).

    compute_dtype: dtype of the depthwise VPU math and the 1x1 matmul
    operands (f32 accumulation).  Default bf16 for v6e/v7x; pass
    jnp.float32 on v5e (no bf16 VPU) or when exact math is needed.
    """
    if stride != 1:
        raise NotImplementedError("block_forward only supports stride=1")

    dw_w = params["dw_w"]            # (3, 3, Cin)
    pw_w = params["pw_w"]            # (Cin, Cout)
    g1, b1, m1, v1 = params["bn1"]   # each (Cin,)
    g2, b2, m2, v2 = params["bn2"]   # each (Cout,)

    N, H, W, Cin = x_nhwc.shape
    Cout = pw_w.shape[1]

    # Fold eval-mode BN: BN1 scale into the depthwise weights; BN2 scale is
    # kept in f32 and applied after the f32-accumulated matmul.
    scale1 = g1 * lax.rsqrt(v1 + eps)
    bias1 = b1 - m1 * scale1
    scale2 = g2 * lax.rsqrt(v2 + eps)
    bias2 = b2 - m2 * scale2

    w1 = (dw_w * scale1).astype(compute_dtype)             # (3, 3, Cin)
    b1k = bias1.astype(compute_dtype).reshape(1, Cin)
    w2 = pw_w.astype(compute_dtype)                        # (Cin, Cout)
    s2k = scale2.astype(jnp.float32).reshape(1, Cout)
    b2k = bias2.astype(jnp.float32).reshape(1, Cout)

    in_bytes = jnp.dtype(x_nhwc.dtype).itemsize
    cd_bytes = jnp.dtype(compute_dtype).itemsize
    TH = _choose_row_tile(N, H, W, Cin, Cout, in_bytes, cd_bytes)
    n_h = H // TH

    return pl.pallas_call(
        _fused_block_kernel,
        out_shape=jax.ShapeDtypeStruct((N, H, W, Cout), jnp.float32),
        grid_spec=pltpu.PrefetchScalarGridSpec(
            num_scalar_prefetch=0,
            grid=(N, n_h),
            in_specs=[
                # TH body rows of the (unpadded) image for this tile.
                pl.BlockSpec((1, TH, W, Cin), lambda n, h: (n, h, 0, 0)),
                # Clamped 1-row halos; edge tiles ignore them in-kernel.
                pl.BlockSpec((1, 1, W, Cin),
                             lambda n, h: (n, jnp.maximum(h * TH - 1, 0), 0, 0)),
                pl.BlockSpec((1, 1, W, Cin),
                             lambda n, h: (n, jnp.minimum((h + 1) * TH, H - 1), 0, 0)),
                # Weights / biases: constant block index -> VMEM-resident.
                pl.BlockSpec((3, 3, Cin), lambda n, h: (0, 0, 0)),
                pl.BlockSpec((1, Cin), lambda n, h: (0, 0)),
                pl.BlockSpec((Cin, Cout), lambda n, h: (0, 0)),
                pl.BlockSpec((1, Cout), lambda n, h: (0, 0)),
                pl.BlockSpec((1, Cout), lambda n, h: (0, 0)),
            ],
            out_specs=pl.BlockSpec((1, TH, W, Cout), lambda n, h: (n, h, 0, 0)),
            scratch_shapes=[pltpu.VMEM((TH, W, Cin), compute_dtype)],
        ),
        compiler_params=pltpu.CompilerParams(
            dimension_semantics=("parallel", "parallel"),
            vmem_limit_bytes=32 * 1024 * 1024,   # v7x-safe (64 MiB physical)
        ),
    )(x_nhwc, x_nhwc, x_nhwc, w1, b1k, w2, s2k, b2k)


# ----------------------------------------------------------------------------
# NCHW wrapper (PyTorch interface).  In a real network keep activations NHWC
# end-to-end and call block_forward_nhwc directly: each transpose below is a
# full HBM pass that exists only to match the NCHW convention.
# ----------------------------------------------------------------------------
def block_forward(x_nchw, params, *, stride=1, eps=1e-5,
                  compute_dtype=jnp.bfloat16):
    x = jnp.transpose(x_nchw, (0, 2, 3, 1))
    y = block_forward_nhwc(x, params, stride=stride, eps=eps,
                           compute_dtype=compute_dtype)
    return jnp.transpose(y, (0, 3, 1, 2))


# ----------------------------------------------------------------------------
# Pure-JAX reference (for correctness check)
# ----------------------------------------------------------------------------
def block_forward_ref(x_nchw, params, *, eps=1e-5):
    dw_w = params["dw_w"]            # (3, 3, Cin)
    pw_w = params["pw_w"]            # (Cin, Cout)
    g1, b1, m1, v1 = params["bn1"]
    g2, b2, m2, v2 = params["bn2"]
    Cin = dw_w.shape[-1]

    x = jnp.transpose(x_nchw, (0, 2, 3, 1))  # NHWC
    dw_hwio = dw_w.reshape(3, 3, 1, Cin)
    y = lax.conv_general_dilated(
        x, dw_hwio, window_strides=(1, 1), padding=((1, 1), (1, 1)),
        dimension_numbers=("NHWC", "HWIO", "NHWC"), feature_group_count=Cin)
    y = (y - m1) / jnp.sqrt(v1 + eps) * g1 + b1
    y = jnp.maximum(y, 0.0)
    z = jnp.einsum("nhwc,cd->nhwd", y, pw_w)
    z = (z - m2) / jnp.sqrt(v2 + eps) * g2 + b2
    z = jnp.maximum(z, 0.0)
    return jnp.transpose(z, (0, 3, 1, 2))


# ----------------------------------------------------------------------------
# Deterministic parameter init (synthetic weights, shapes match nn.Module)
# ----------------------------------------------------------------------------
def make_params(key, in_channels, out_channels):
    k1, k2, k3, k4, k5, k6 = jax.random.split(key, 6)
    # conv1: torch weight (Cin, 1, 3, 3) -> stored as (3, 3, Cin)
    dw_w = 0.3 * jax.random.normal(k1, (3, 3, in_channels), jnp.float32)
    # conv2: torch weight (Cout, Cin, 1, 1) -> stored as (Cin, Cout)
    pw_w = 0.3 * jax.random.normal(k2, (in_channels, out_channels), jnp.float32)
    bn1 = (
        1.0 + 0.1 * jax.random.normal(k3, (in_channels,), jnp.float32),
        0.05 * jax.random.normal(k4, (in_channels,), jnp.float32),
        0.1 * jax.random.normal(k5, (in_channels,), jnp.float32),
        jnp.abs(jax.random.normal(k6, (in_channels,), jnp.float32)) + 0.5,
    )
    k7, k8, k9, k10 = jax.random.split(k1, 4)
    bn2 = (
        1.0 + 0.1 * jax.random.normal(k7, (out_channels,), jnp.float32),
        0.05 * jax.random.normal(k8, (out_channels,), jnp.float32),
        0.1 * jax.random.normal(k9, (out_channels,), jnp.float32),
        jnp.abs(jax.random.normal(k10, (out_channels,), jnp.float32)) + 0.5,
    )
    return {"dw_w": dw_w, "pw_w": pw_w, "bn1": bn1, "bn2": bn2}


if __name__ == "__main__":
    key = jax.random.PRNGKey(0)
    kx, kp = jax.random.split(key)

    N, Cin, Cout, H, W = 2, 4, 8, 16, 16
    x = jax.random.normal(kx, (N, Cin, H, W), jnp.float32)   # NCHW like PyTorch
    params = make_params(kp, Cin, Cout)

    ref = jax.block_until_ready(block_forward_ref(x, params))

    # f32 compute path — checked tightly against the reference.
    f32_fwd = jax.jit(functools.partial(block_forward,
                                        compute_dtype=jnp.float32))
    out_f32 = jax.block_until_ready(f32_fwd(x, params))
    assert out_f32.shape == (N, Cout, H, W), out_f32.shape
    np.testing.assert_allclose(np.asarray(out_f32), np.asarray(ref),
                               rtol=1e-4, atol=1e-4)

    # bf16 compute path (default; v6e/v7x perf path, f32 accumulation).
    out_bf16 = jax.block_until_ready(jax.jit(block_forward)(x, params))
    np.testing.assert_allclose(np.asarray(out_bf16), np.asarray(ref),
                               rtol=1e-1, atol=1e-1)

    print("KERNEL_OK")
</pallas_src>

<mosaic_0001>
module attributes {stable_mosaic.version = 11 : i64} {
  func.func @_fused_block_kernel(%arg0: i32, %arg1: i32, %arg2: memref<1x8x16x4xf32, #tpu.memory_space<vmem>>, %arg3: memref<1x1x16x4xf32, #tpu.memory_space<vmem>>, %arg4: memref<1x1x16x4xf32, #tpu.memory_space<vmem>>, %arg5: memref<3x3x4xf32, #tpu.memory_space<vmem>>, %arg6: memref<1x4xf32, #tpu.memory_space<vmem>>, %arg7: memref<4x8xf32, #tpu.memory_space<vmem>>, %arg8: memref<1x8xf32, #tpu.memory_space<vmem>>, %arg9: memref<1x8xf32, #tpu.memory_space<vmem>>, %arg10: memref<1x8x16x8xf32, #tpu.memory_space<vmem>>, %arg11: memref<8x16x4xf32, #tpu.memory_space<vmem>>) attributes {dimension_semantics = [#tpu.dimension_semantics<parallel>, #tpu.dimension_semantics<parallel>], iteration_bounds = array<i64: 2, 2>, scalar_prefetch = 0 : i64, scratch_operands = 1 : i64, tpu.core_type = #tpu.core_type<tc>, window_params = [{transform_indices = @transform_0, window_bounds = array<i64: 1, 8, 16, 4>}, {transform_indices = @transform_1, window_bounds = array<i64: 1, 1, 16, 4>}, {transform_indices = @transform_2, window_bounds = array<i64: 1, 1, 16, 4>}, {pipeline_mode = #tpu.pipeline_mode<synchronous>, transform_indices = @transform_3, window_bounds = array<i64: 3, 3, 4>}, {pipeline_mode = #tpu.pipeline_mode<synchronous>, transform_indices = @transform_4, window_bounds = array<i64: 1, 4>}, {pipeline_mode = #tpu.pipeline_mode<synchronous>, transform_indices = @transform_5, window_bounds = array<i64: 4, 8>}, {pipeline_mode = #tpu.pipeline_mode<synchronous>, transform_indices = @transform_6, window_bounds = array<i64: 1, 8>}, {pipeline_mode = #tpu.pipeline_mode<synchronous>, transform_indices = @transform_7, window_bounds = array<i64: 1, 8>}, {transform_indices = @transform_8, window_bounds = array<i64: 1, 8, 16, 8>}]} {
    %c0 = arith.constant 0 : index
    %c0_0 = arith.constant 0 : index
    %c0_1 = arith.constant 0 : index
    %0 = vector.load %arg5[%c0, %c0_0, %c0_1] : memref<3x3x4xf32, #tpu.memory_space<vmem>>, vector<3x3x4xf32>
    %c0_2 = arith.constant 0 : index
    %c0_3 = arith.constant 0 : index
    %c0_4 = arith.constant 0 : index
    %c0_5 = arith.constant 0 : index
    %1 = vector.load %arg2[%c0_2, %c0_3, %c0_4, %c0_5] : memref<1x8x16x4xf32, #tpu.memory_space<vmem>>, vector<1x8x16x4xf32>
    %2 = vector.shape_cast %1 : vector<1x8x16x4xf32> to vector<8x16x4xf32>
    %c1_i32 = arith.constant 1 : i32
    %3 = tpu.dynamic_rotate %2 by %c1_i32 dim 1 : vector<8x16x4xf32>, i32 -> vector<8x16x4xf32>
    %4 = tpu.iota {dimensions = array<i32: 1>} : vector<8x16x4xi32>
    %c0_i32 = arith.constant 0 : i32
    %5 = vector.broadcast %c0_i32 : i32 to vector<8x16x4xi32>
    %6 = arith.cmpi eq, %4, %5 : vector<8x16x4xi32>
    %cst = arith.constant 0.000000e+00 : f32
    %7 = vector.broadcast %cst : f32 to vector<8x16x4xf32>
    %8 = arith.select %6, %7, %3 : vector<8x16x4xi1>, vector<8x16x4xf32>
    %c15_i32 = arith.constant 15 : i32
    %9 = tpu.dynamic_rotate %2 by %c15_i32 dim 1 : vector<8x16x4xf32>, i32 -> vector<8x16x4xf32>
    %10 = tpu.iota {dimensions = array<i32: 1>} : vector<8x16x4xi32>
    %c15_i32_6 = arith.constant 15 : i32
    %11 = vector.broadcast %c15_i32_6 : i32 to vector<8x16x4xi32>
    %12 = arith.cmpi eq, %10, %11 : vector<8x16x4xi32>
    %cst_7 = arith.constant 0.000000e+00 : f32
    %13 = vector.broadcast %cst_7 : f32 to vector<8x16x4xf32>
    %14 = arith.select %12, %13, %9 : vector<8x16x4xi1>, vector<8x16x4xf32>
    %15 = vector.extract_strided_slice %0 {offsets = [1, 0, 0], sizes = [1, 1, 4], strides = [1, 1, 1]} : vector<3x3x4xf32> to vector<1x1x4xf32>
    %16 = vector.shape_cast %15 : vector<1x1x4xf32> to vector<4xf32>
    %17 = vector.shape_cast %16 : vector<4xf32> to vector<1x1x4xf32>
    %18 = vector.broadcast %17 : vector<1x1x4xf32> to vector<8x16x4xf32>
    %19 = arith.mulf %8, %18 : vector<8x16x4xf32>
    %20 = vector.extract_strided_slice %0 {offsets = [1, 1, 0], sizes = [1, 1, 4], strides = [1, 1, 1]} : vector<3x3x4xf32> to vector<1x1x4xf32>
    %21 = vector.shape_cast %20 : vector<1x1x4xf32> to vector<4xf32>
    %22 = vector.shape_cast %21 : vector<4xf32> to vector<1x1x4xf32>
    %23 = vector.broadcast %22 : vector<1x1x4xf32> to vector<8x16x4xf32>
    %24 = arith.mulf %2, %23 : vector<8x16x4xf32>
    %25 = arith.addf %19, %24 : vector<8x16x4xf32>
    %26 = vector.extract_strided_slice %0 {offsets = [1, 2, 0], sizes = [1, 1, 4], strides = [1, 1, 1]} : vector<3x3x4xf32> to vector<1x1x4xf32>
    %27 = vector.shape_cast %26 : vector<1x1x4xf32> to vector<4xf32>
    %28 = vector.shape_cast %27 : vector<4xf32> to vector<1x1x4xf32>
    %29 = vector.broadcast %28 : vector<1x1x4xf32> to vector<8x16x4xf32>
    %30 = arith.mulf %14, %29 : vector<8x16x4xf32>
    %31 = arith.addf %25, %30 : vector<8x16x4xf32>
    %c0_8 = arith.constant 0 : index
    %c0_9 = arith.constant 0 : index
    %c0_10 = arith.constant 0 : index
    %32 = vector.load %arg11[%c0_8, %c0_9, %c0_10] : memref<8x16x4xf32, #tpu.memory_space<vmem>>, vector<8x16x4xf32>
    tpu.vector_store %arg11[%c0_8, %c0_9, %c0_10], %31 {strides = array<i32>} : memref<8x16x4xf32, #tpu.memory_space<vmem>>, vector<8x16x4xf32>,
    %c1 = arith.constant 1 : index
    %c0_11 = arith.constant 0 : index
    %c0_12 = arith.constant 0 : index
    %33 = vector.load %arg11[%c1, %c0_11, %c0_12] : memref<8x16x4xf32, #tpu.memory_space<vmem>>, vector<7x16x4xf32>
    %34 = vector.extract_strided_slice %8 {offsets = [0, 0, 0], sizes = [7, 16, 4], strides = [1, 1, 1]} : vector<8x16x4xf32> to vector<7x16x4xf32>
    %35 = vector.extract_strided_slice %0 {offsets = [0, 0, 0], sizes = [1, 1, 4], strides = [1, 1, 1]} : vector<3x3x4xf32> to vector<1x1x4xf32>
    %36 = vector.shape_cast %35 : vector<1x1x4xf32> to vector<4xf32>
    %37 = vector.shape_cast %36 : vector<4xf32> to vector<1x1x4xf32>
    %38 = vector.broadcast %37 : vector<1x1x4xf32> to vector<7x16x4xf32>
    %39 = arith.mulf %34, %38 : vector<7x16x4xf32>
    %40 = vector.extract_strided_slice %2 {offsets = [0, 0, 0], sizes = [7, 16, 4], strides = [1, 1, 1]} : vector<8x16x4xf32> to vector<7x16x4xf32>
    %41 = vector.extract_strided_slice %0 {offsets = [0, 1, 0], sizes = [1, 1, 4], strides = [1, 1, 1]} : vector<3x3x4xf32> to vector<1x1x4xf32>
    %42 = vector.shape_cast %41 : vector<1x1x4xf32> to vector<4xf32>
    %43 = vector.shape_cast %42 : vector<4xf32> to vector<1x1x4xf32>
    %44 = vector.broadcast %43 : vector<1x1x4xf32> to vector<7x16x4xf32>
    %45 = arith.mulf %40, %44 : vector<7x16x4xf32>
    %46 = arith.addf %39, %45 : vector<7x16x4xf32>
    %47 = vector.extract_strided_slice %14 {offsets = [0, 0, 0], sizes = [7, 16, 4], strides = [1, 1, 1]} : vector<8x16x4xf32> to vector<7x16x4xf32>
    %48 = vector.extract_strided_slice %0 {offsets = [0, 2, 0], sizes = [1, 1, 4], strides = [1, 1, 1]} : vector<3x3x4xf32> to vector<1x1x4xf32>
    %49 = vector.shape_cast %48 : vector<1x1x4xf32> to vector<4xf32>
    %50 = vector.shape_cast %49 : vector<4xf32> to vector<1x1x4xf32>
    %51 = vector.broadcast %50 : vector<1x1x4xf32> to vector<7x16x4xf32>
    %52 = arith.mulf %47, %51 : vector<7x16x4xf32>
    %53 = arith.addf %46, %52 : vector<7x16x4xf32>
    %54 = arith.addf %33, %53 : vector<7x16x4xf32>
    %c1_13 = arith.constant 1 : index
    %c0_14 = arith.constant 0 : index
    %c0_15 = arith.constant 0 : index
    %55 = vector.load %arg11[%c1_13, %c0_14, %c0_15] : memref<8x16x4xf32, #tpu.memory_space<vmem>>, vector<7x16x4xf32>
    tpu.vector_store %arg11[%c1_13, %c0_14, %c0_15], %54 {strides = array<i32>} : memref<8x16x4xf32, #tpu.memory_space<vmem>>, vector<7x16x4xf32>,
    %c0_16 = arith.constant 0 : index
    %c0_17 = arith.constant 0 : index
    %c0_18 = arith.constant 0 : index
    %56 = vector.load %arg11[%c0_16, %c0_17, %c0_18] : memref<8x16x4xf32, #tpu.memory_space<vmem>>, vector<7x16x4xf32>
    %57 = vector.extract_strided_slice %8 {offsets = [1, 0, 0], sizes = [7, 16, 4], strides = [1, 1, 1]} : vector<8x16x4xf32> to vector<7x16x4xf32>
    %58 = vector.extract_strided_slice %0 {offsets = [2, 0, 0], sizes = [1, 1, 4], strides = [1, 1, 1]} : vector<3x3x4xf32> to vector<1x1x4xf32>
    %59 = vector.shape_cast %58 : vector<1x1x4xf32> to vector<4xf32>
    %60 = vector.shape_cast %59 : vector<4xf32> to vector<1x1x4xf32>
    %61 = vector.broadcast %60 : vector<1x1x4xf32> to vector<7x16x4xf32>
    %62 = arith.mulf %57, %61 : vector<7x16x4xf32>
    %63 = vector.extract_strided_slice %2 {offsets = [1, 0, 0], sizes = [7, 16, 4], strides = [1, 1, 1]} : vector<8x16x4xf32> to vector<7x16x4xf32>
    %64 = vector.extract_strided_slice %0 {offsets = [2, 1, 0], sizes = [1, 1, 4], strides = [1, 1, 1]} : vector<3x3x4xf32> to vector<1x1x4xf32>
    %65 = vector.shape_cast %64 : vector<1x1x4xf32> to vector<4xf32>
    %66 = vector.shape_cast %65 : vector<4xf32> to vector<1x1x4xf32>
    %67 = vector.broadcast %66 : vector<1x1x4xf32> to vector<7x16x4xf32>
    %68 = arith.mulf %63, %67 : vector<7x16x4xf32>
    %69 = arith.addf %62, %68 : vector<7x16x4xf32>
    %70 = vector.extract_strided_slice %14 {offsets = [1, 0, 0], sizes = [7, 16, 4], strides = [1, 1, 1]} : vector<8x16x4xf32> to vector<7x16x4xf32>
    %71 = vector.extract_strided_slice %0 {offsets = [2, 2, 0], sizes = [1, 1, 4], strides = [1, 1, 1]} : vector<3x3x4xf32> to vector<1x1x4xf32>
    %72 = vector.shape_cast %71 : vector<1x1x4xf32> to vector<4xf32>
    %73 = vector.shape_cast %72 : vector<4xf32> to vector<1x1x4xf32>
    %74 = vector.broadcast %73 : vector<1x1x4xf32> to vector<7x16x4xf32>
    %75 = arith.mulf %70, %74 : vector<7x16x4xf32>
    %76 = arith.addf %69, %75 : vector<7x16x4xf32>
    %77 = arith.addf %56, %76 : vector<7x16x4xf32>
    %c0_19 = arith.constant 0 : index
    %c0_20 = arith.constant 0 : index
    %c0_21 = arith.constant 0 : index
    %78 = vector.load %arg11[%c0_19, %c0_20, %c0_21] : memref<8x16x4xf32, #tpu.memory_space<vmem>>, vector<7x16x4xf32>
    tpu.vector_store %arg11[%c0_19, %c0_20, %c0_21], %77 {strides = array<i32>} : memref<8x16x4xf32, #tpu.memory_space<vmem>>, vector<7x16x4xf32>,
    %c0_i32_22 = arith.constant 0 : i32
    %79 = arith.cmpi sgt, %arg1, %c0_i32_22 : i32
    %80 = arith.extui %79 : i1 to i32
    %c0_i32_23 = arith.constant 0 : i32
    %81 = arith.cmpi ne, %80, %c0_i32_23 : i32
    scf.if %81 {
      %c0_44 = arith.constant 0 : index
      %c0_45 = arith.constant 0 : index
      %c0_46 = arith.constant 0 : index
      %c0_47 = arith.constant 0 : index
      %105 = vector.load %arg3[%c0_44, %c0_45, %c0_46, %c0_47] : memref<1x1x16x4xf32, #tpu.memory_space<vmem>>, vector<1x1x16x4xf32>
      %106 = vector.shape_cast %105 : vector<1x1x16x4xf32> to vector<1x16x4xf32>
      %c1_i32_48 = arith.constant 1 : i32
      %107 = tpu.dynamic_rotate %106 by %c1_i32_48 dim 1 : vector<1x16x4xf32>, i32 -> vector<1x16x4xf32>
      %108 = tpu.iota {dimensions = array<i32: 1>} : vector<1x16x4xi32>
      %c0_i32_49 = arith.constant 0 : i32
      %109 = vector.broadcast %c0_i32_49 : i32 to vector<1x16x4xi32>
      %110 = arith.cmpi eq, %108, %109 : vector<1x16x4xi32>
      %cst_50 = arith.constant 0.000000e+00 : f32
      %111 = vector.broadcast %cst_50 : f32 to vector<1x16x4xf32>
      %112 = arith.select %110, %111, %107 : vector<1x16x4xi1>, vector<1x16x4xf32>
      %c15_i32_51 = arith.constant 15 : i32
      %113 = tpu.dynamic_rotate %106 by %c15_i32_51 dim 1 : vector<1x16x4xf32>, i32 -> vector<1x16x4xf32>
      %114 = tpu.iota {dimensions = array<i32: 1>} : vector<1x16x4xi32>
      %c15_i32_52 = arith.constant 15 : i32
      %115 = vector.broadcast %c15_i32_52 : i32 to vector<1x16x4xi32>
      %116 = arith.cmpi eq, %114, %115 : vector<1x16x4xi32>
      %cst_53 = arith.constant 0.000000e+00 : f32
      %117 = vector.broadcast %cst_53 : f32 to vector<1x16x4xf32>
      %118 = arith.select %116, %117, %113 : vector<1x16x4xi1>, vector<1x16x4xf32>
      %c0_54 = arith.constant 0 : index
      %c0_55 = arith.constant 0 : index
      %c0_56 = arith.constant 0 : index
      %119 = vector.load %arg11[%c0_54, %c0_55, %c0_56] : memref<8x16x4xf32, #tpu.memory_space<vmem>>, vector<1x16x4xf32>
      %120 = vector.extract_strided_slice %0 {offsets = [0, 0, 0], sizes = [1, 1, 4], strides = [1, 1, 1]} : vector<3x3x4xf32> to vector<1x1x4xf32>
      %121 = vector.shape_cast %120 : vector<1x1x4xf32> to vector<4xf32>
      %122 = vector.shape_cast %121 : vector<4xf32> to vector<1x1x4xf32>
      %123 = vector.broadcast %122 : vector<1x1x4xf32> to vector<1x16x4xf32>
      %124 = arith.mulf %112, %123 : vector<1x16x4xf32>
      %125 = vector.extract_strided_slice %0 {offsets = [0, 1, 0], sizes = [1, 1, 4], strides = [1, 1, 1]} : vector<3x3x4xf32> to vector<1x1x4xf32>
      %126 = vector.shape_cast %125 : vector<1x1x4xf32> to vector<4xf32>
      %127 = vector.shape_cast %126 : vector<4xf32> to vector<1x1x4xf32>
      %128 = vector.broadcast %127 : vector<1x1x4xf32> to vector<1x16x4xf32>
      %129 = arith.mulf %106, %128 : vector<1x16x4xf32>
      %130 = arith.addf %124, %129 : vector<1x16x4xf32>
      %131 = vector.extract_strided_slice %0 {offsets = [0, 2, 0], sizes = [1, 1, 4], strides = [1, 1, 1]} : vector<3x3x4xf32> to vector<1x1x4xf32>
      %132 = vector.shape_cast %131 : vector<1x1x4xf32> to vector<4xf32>
      %133 = vector.shape_cast %132 : vector<4xf32> to vector<1x1x4xf32>
      %134 = vector.broadcast %133 : vector<1x1x4xf32> to vector<1x16x4xf32>
      %135 = arith.mulf %118, %134 : vector<1x16x4xf32>
      %136 = arith.addf %130, %135 : vector<1x16x4xf32>
      %137 = arith.addf %119, %136 : vector<1x16x4xf32>
      %c0_57 = arith.constant 0 : index
      %c0_58 = arith.constant 0 : index
      %c0_59 = arith.constant 0 : index
      %138 = vector.load %arg11[%c0_57, %c0_58, %c0_59] : memref<8x16x4xf32, #tpu.memory_space<vmem>>, vector<1x16x4xf32>
      tpu.vector_store %arg11[%c0_57, %c0_58, %c0_59], %137 {strides = array<i32>} : memref<8x16x4xf32, #tpu.memory_space<vmem>>, vector<1x16x4xf32>,
    } else {
    }
    %c1_i32_24 = arith.constant 1 : i32
    %82 = arith.cmpi slt, %arg1, %c1_i32_24 : i32
    %83 = arith.extui %82 : i1 to i32
    %c0_i32_25 = arith.constant 0 : i32
    %84 = arith.cmpi ne, %83, %c0_i32_25 : i32
    scf.if %84 {
      %c0_44 = arith.constant 0 : index
      %c0_45 = arith.constant 0 : index
      %c0_46 = arith.constant 0 : index
      %c0_47 = arith.constant 0 : index
      %105 = vector.load %arg4[%c0_44, %c0_45, %c0_46, %c0_47] : memref<1x1x16x4xf32, #tpu.memory_space<vmem>>, vector<1x1x16x4xf32>
      %106 = vector.shape_cast %105 : vector<1x1x16x4xf32> to vector<1x16x4xf32>
      %c1_i32_48 = arith.constant 1 : i32
      %107 = tpu.dynamic_rotate %106 by %c1_i32_48 dim 1 : vector<1x16x4xf32>, i32 -> vector<1x16x4xf32>
      %108 = tpu.iota {dimensions = array<i32: 1>} : vector<1x16x4xi32>
      %c0_i32_49 = arith.constant 0 : i32
      %109 = vector.broadcast %c0_i32_49 : i32 to vector<1x16x4xi32>
      %110 = arith.cmpi eq, %108, %109 : vector<1x16x4xi32>
      %cst_50 = arith.constant 0.000000e+00 : f32
      %111 = vector.broadcast %cst_50 : f32 to vector<1x16x4xf32>
      %112 = arith.select %110, %111, %107 : vector<1x16x4xi1>, vector<1x16x4xf32>
      %c15_i32_51 = arith.constant 15 : i32
      %113 = tpu.dynamic_rotate %106 by %c15_i32_51 dim 1 : vector<1x16x4xf32>, i32 -> vector<1x16x4xf32>
      %114 = tpu.iota {dimensions = array<i32: 1>} : vector<1x16x4xi32>
      %c15_i32_52 = arith.constant 15 : i32
      %115 = vector.broadcast %c15_i32_52 : i32 to vector<1x16x4xi32>
      %116 = arith.cmpi eq, %114, %115 : vector<1x16x4xi32>
      %cst_53 = arith.constant 0.000000e+00 : f32
      %117 = vector.broadcast %cst_53 : f32 to vector<1x16x4xf32>
      %118 = arith.select %116, %117, %113 : vector<1x16x4xi1>, vector<1x16x4xf32>
      %c7 = arith.constant 7 : index
      %c0_54 = arith.constant 0 : index
      %c0_55 = arith.constant 0 : index
      %119 = vector.load %arg11[%c7, %c0_54, %c0_55] : memref<8x16x4xf32, #tpu.memory_space<vmem>>, vector<1x16x4xf32>
      %120 = vector.extract_strided_slice %0 {offsets = [2, 0, 0], sizes = [1, 1, 4], strides = [1, 1, 1]} : vector<3x3x4xf32> to vector<1x1x4xf32>
      %121 = vector.shape_cast %120 : vector<1x1x4xf32> to vector<4xf32>
      %122 = vector.shape_cast %121 : vector<4xf32> to vector<1x1x4xf32>
      %123 = vector.broadcast %122 : vector<1x1x4xf32> to vector<1x16x4xf32>
      %124 = arith.mulf %112, %123 : vector<1x16x4xf32>
      %125 = vector.extract_strided_slice %0 {offsets = [2, 1, 0], sizes = [1, 1, 4], strides = [1, 1, 1]} : vector<3x3x4xf32> to vector<1x1x4xf32>
      %126 = vector.shape_cast %125 : vector<1x1x4xf32> to vector<4xf32>
      %127 = vector.shape_cast %126 : vector<4xf32> to vector<1x1x4xf32>
      %128 = vector.broadcast %127 : vector<1x1x4xf32> to vector<1x16x4xf32>
      %129 = arith.mulf %106, %128 : vector<1x16x4xf32>
      %130 = arith.addf %124, %129 : vector<1x16x4xf32>
      %131 = vector.extract_strided_slice %0 {offsets = [2, 2, 0], sizes = [1, 1, 4], strides = [1, 1, 1]} : vector<3x3x4xf32> to vector<1x1x4xf32>
      %132 = vector.shape_cast %131 : vector<1x1x4xf32> to vector<4xf32>
      %133 = vector.shape_cast %132 : vector<4xf32> to vector<1x1x4xf32>
      %134 = vector.broadcast %133 : vector<1x1x4xf32> to vector<1x16x4xf32>
      %135 = arith.mulf %118, %134 : vector<1x16x4xf32>
      %136 = arith.addf %130, %135 : vector<1x16x4xf32>
      %137 = arith.addf %119, %136 : vector<1x16x4xf32>
      %c7_56 = arith.constant 7 : index
      %c0_57 = arith.constant 0 : index
      %c0_58 = arith.constant 0 : index
      %138 = vector.load %arg11[%c7_56, %c0_57, %c0_58] : memref<8x16x4xf32, #tpu.memory_space<vmem>>, vector<1x16x4xf32>
      tpu.vector_store %arg11[%c7_56, %c0_57, %c0_58], %137 {strides = array<i32>} : memref<8x16x4xf32, #tpu.memory_space<vmem>>, vector<1x16x4xf32>,
    } else {
    }
    %c0_26 = arith.constant 0 : index
    %c0_27 = arith.constant 0 : index
    %c0_28 = arith.constant 0 : index
    %85 = vector.load %arg11[%c0_26, %c0_27, %c0_28] : memref<8x16x4xf32, #tpu.memory_space<vmem>>, vector<8x16x4xf32>
    %c0_29 = arith.constant 0 : index
    %c0_30 = arith.constant 0 : index
    %86 = vector.load %arg6[%c0_29, %c0_30] : memref<1x4xf32, #tpu.memory_space<vmem>>, vector<1x4xf32>
    %87 = vector.shape_cast %86 : vector<1x4xf32> to vector<1x1x4xf32>
    %88 = vector.broadcast %87 : vector<1x1x4xf32> to vector<8x16x4xf32>
    %89 = arith.addf %85, %88 : vector<8x16x4xf32>
    %cst_31 = arith.constant 0.000000e+00 : f32
    %90 = vector.broadcast %cst_31 : f32 to vector<8x16x4xf32>
    %91 = arith.maximumf %89, %90 : vector<8x16x4xf32>
    %92 = vector.shape_cast %91 : vector<8x16x4xf32> to vector<128x4xf32>
    %c0_32 = arith.constant 0 : index
    %c0_33 = arith.constant 0 : index
    %93 = vector.load %arg7[%c0_32, %c0_33] : memref<4x8xf32, #tpu.memory_space<vmem>>, vector<4x8xf32>
    %cst_34 = arith.constant dense<0.000000e+00> : vector<128x8xf32>
    %94 = tpu.matmul %92, %93, %cst_34 {dimension_numbers = #tpu.dot_dimension_numbers<[1], [0], [0], [1], [0, 0, 1, 1], [], []>} : vector<128x4xf32>, vector<4x8xf32>, vector<128x8xf32> -> vector<128x8xf32>
    %c0_35 = arith.constant 0 : index
    %c0_36 = arith.constant 0 : index
    %95 = vector.load %arg8[%c0_35, %c0_36] : memref<1x8xf32, #tpu.memory_space<vmem>>, vector<1x8xf32>
    %96 = vector.broadcast %95 : vector<1x8xf32> to vector<128x8xf32>
    %97 = arith.mulf %94, %96 : vector<128x8xf32>
    %c0_37 = arith.constant 0 : index
    %c0_38 = arith.constant 0 : index
    %98 = vector.load %arg9[%c0_37, %c0_38] : memref<1x8xf32, #tpu.memory_space<vmem>>, vector<1x8xf32>
    %99 = vector.broadcast %98 : vector<1x8xf32> to vector<128x8xf32>
    %100 = arith.addf %97, %99 : vector<128x8xf32>
    %cst_39 = arith.constant 0.000000e+00 : f32
    %101 = vector.broadcast %cst_39 : f32 to vector<128x8xf32>
    %102 = arith.maximumf %100, %101 : vector<128x8xf32>
    %103 = vector.shape_cast %102 : vector<128x8xf32> to vector<1x8x16x8xf32>
    %c0_40 = arith.constant 0 : index
    %c0_41 = arith.constant 0 : index
    %c0_42 = arith.constant 0 : index
    %c0_43 = arith.constant 0 : index
    %104 = vector.load %arg10[%c0_40, %c0_41, %c0_42, %c0_43] : memref<1x8x16x8xf32, #tpu.memory_space<vmem>>, vector<1x8x16x8xf32>
    tpu.vector_store %arg10[%c0_40, %c0_41, %c0_42, %c0_43], %103 {strides = array<i32>} : memref<1x8x16x8xf32, #tpu.memory_space<vmem>>, vector<1x8x16x8xf32>,
    return
  }
  func.func @transform_0(%arg0: i32, %arg1: i32) -> (i32, i32, i32, i32) {
    %c0_i32 = arith.constant 0 : i32
    %c0_i32_0 = arith.constant 0 : i32
    %c0_i32_1 = arith.constant 0 : i32
    return %arg0, %arg1, %c0_i32, %c0_i32_0 : i32, i32, i32, i32
  }
  func.func @transform_1(%arg0: i32, %arg1: i32) -> (i32, i32, i32, i32) {
    %c8_i32 = arith.constant 8 : i32
    %0 = arith.muli %arg1, %c8_i32 : i32
    %c1_i32 = arith.constant 1 : i32
    %1 = arith.subi %0, %c1_i32 : i32
    %c0_i32 = arith.constant 0 : i32
    %2 = arith.maxsi %1, %c0_i32 : i32
    %c0_i32_0 = arith.constant 0 : i32
    %c0_i32_1 = arith.constant 0 : i32
    %c0_i32_2 = arith.constant 0 : i32
    return %arg0, %2, %c0_i32_0, %c0_i32_1 : i32, i32, i32, i32
  }
  func.func @transform_2(%arg0: i32, %arg1: i32) -> (i32, i32, i32, i32) {
    %c1_i32 = arith.constant 1 : i32
    %0 = arith.addi %arg1, %c1_i32 : i32
    %c8_i32 = arith.constant 8 : i32
    %1 = arith.muli %0, %c8_i32 : i32
    %c15_i32 = arith.constant 15 : i32
    %2 = arith.minsi %1, %c15_i32 : i32
    %c0_i32 = arith.constant 0 : i32
    %c0_i32_0 = arith.constant 0 : i32
    %c0_i32_1 = arith.constant 0 : i32
    return %arg0, %2, %c0_i32, %c0_i32_0 : i32, i32, i32, i32
  }
  func.func @transform_3(%arg0: i32, %arg1: i32) -> (i32, i32, i32) {
    %c0_i32 = arith.constant 0 : i32
    %c0_i32_0 = arith.constant 0 : i32
    %c0_i32_1 = arith.constant 0 : i32
    %c0_i32_2 = arith.constant 0 : i32
    return %c0_i32, %c0_i32_0, %c0_i32_1 : i32, i32, i32
  }
  func.func @transform_4(%arg0: i32, %arg1: i32) -> (i32, i32) {
    %c0_i32 = arith.constant 0 : i32
    %c0_i32_0 = arith.constant 0 : i32
    %c0_i32_1 = arith.constant 0 : i32
    return %c0_i32, %c0_i32_0 : i32, i32
  }
  func.func @transform_5(%arg0: i32, %arg1: i32) -> (i32, i32) {
    %c0_i32 = arith.constant 0 : i32
    %c0_i32_0 = arith.constant 0 : i32
    %c0_i32_1 = arith.constant 0 : i32
    return %c0_i32, %c0_i32_0 : i32, i32
  }
  func.func @transform_6(%arg0: i32, %arg1: i32) -> (i32, i32) {
    %c0_i32 = arith.constant 0 : i32
    %c0_i32_0 = arith.constant 0 : i32
    %c0_i32_1 = arith.constant 0 : i32
    return %c0_i32, %c0_i32_0 : i32, i32
  }
  func.func @transform_7(%arg0: i32, %arg1: i32) -> (i32, i32) {
    %c0_i32 = arith.constant 0 : i32
    %c0_i32_0 = arith.constant 0 : i32
    %c0_i32_1 = arith.constant 0 : i32
    return %c0_i32, %c0_i32_0 : i32, i32
  }
  func.func @transform_8(%arg0: i32, %arg1: i32) -> (i32, i32, i32, i32) {
    %c0_i32 = arith.constant 0 : i32
    %c0_i32_0 = arith.constant 0 : i32
    %c0_i32_1 = arith.constant 0 : i32
    return %arg0, %arg1, %c0_i32, %c0_i32_0 : i32, i32, i32, i32
  }
}

</mosaic_0001>

<bundles_post_ra>
// kernel: block_forward.1
= control target key start
LH: loop header
LB: loop body
LE: loop exit
PB: predicated region body
PF: predicated region fallthrough
CT: control target
= control target key end

     0   :  { %s1736_s27 = smov 0   ;;  %s1738_s28 = smov 0   ;;  %s2560_s0 = inlined_call_operand.vmem [shape: f32[2,16,16,4], index: 0, kind: input, shape index: {}, may-alias: {0,1,2}]   ;;  %s2561_s1 = inlined_call_operand.vmem [shape: f32[2,16,16,4], index: 1, kind: input, shape index: {}, may-alias: {0,1,2}]   ;;  %s2562_s2 = inlined_call_operand.vmem [shape: f32[2,16,16,4], index: 2, kind: input, shape index: {}, may-alias: {0,1,2}]   ;;  %s2563_s3 = inlined_call_operand.vmem [shape: f32[3,3,4], index: 3, kind: input, shape index: {}]   ;;  %s2564_s4 = inlined_call_operand.vmem [shape: f32[1,4], index: 4, kind: input, shape index: {}]   ;;  %s2565_s5 = inlined_call_operand.vmem [shape: f32[4,8], index: 5, kind: input, shape index: {}]   ;;  %s2566_s6 = inlined_call_operand.vmem [shape: f32[1,8], index: 6, kind: input, shape index: {}]   ;;  %s2567_s7 = inlined_call_operand.vmem [shape: f32[1,8], index: 7, kind: input, shape index: {}]   ;;  %s2568_s8 = inlined_call_operand.vmem [shape: f32[2,16,16,8], index: 8, kind: output, shape index: {}]  }
   0x1   :  { %s1740_s29 = smov 0   ;;  %s1742_s30 = smov 0  }
   0x2   :  { %s1744_s9 = smov 0  }
   0x3 LB: > { %s27_s10 = sadd.s32 1, %s1681_s29  ;;  %s30_s11 = sadd.s32 1, %s1685_s30  ;;  %s1689_s9 = sphi %s1744_s9, %s18_s9   ;;  %s1685_s30 = sphi %s1742_s30, %s2645_s30   ;;  %s1681_s29 = sphi %s1740_s29, %s2644_s29   ;;  %s1677_s28 = sphi %s1738_s28, %s2643_s28   ;;  %s1673_s27 = sphi %s1736_s27, %s2642_s27  }
   0x4   : > { %p28_p0 = scmp.ge.s32.totalorder %s27_s10, 2  ;;  %p1508_p1 = scmp.ge.s32.totalorder %s1689_s9, 1 }
   0x5   : > { %p348_p2 = scmp.lt.s32.totalorder %s1689_s9, 5 }
   0x6   : > { %s2647_s10 = smov (%p28_p0, %s27_s10), 0  ;;  %s2649_s11 = smov (!%p28_p0, %s30_s11), %s1685_s30 }
   0x7   : > { %p349_p3 = pnand %p1508_p1, %p348_p2  ;;  %p32_p4 = scmp.ge.s32.totalorder %s2649_s11, 2 }
   0x9   : > { %s2651_s11 = smov (%p32_p4, %s2649_s11), 0  ;;  %352 = sbr.rel (%p349_p3) target bundleno = 380 (0x17c), region = 52 }
  0x10   : > { %s1769_s12 = sshll.u32 %s1673_s27, 3  ;;  %p419_p5 = scmp.lt.s32.totalorder %s1677_s28, 1  ;;  %v509_v0 = vlaneseq  ;;  %v474_v2 = vld [vmem:[%s2563_s3] sm:$0x7]  ;;  %v475_v3 = vld [vmem:[%s2563_s3 + $0x4] sm:$0x7] }
  0x11   : > { %p421_p6 = scmp.lt.s32.totalorder %s1769_s12, 15  ;;  %s1773_s13 = sadd.s32 4294967295, %s1769_s12  ;;  %v476_v5 = vld [vmem:[%s2563_s3 + $0x8] sm:$0x7]  ;;  %vm690_vm3 = vcmask 31744  }
  0x12   : > { %s2653_s28 = smov (!%p419_p5, %s1677_s28), 1  ;;  %v1775_v1 = vshrl.u32 %v509_v0, 7  ;;  %p431_p7 = scmp.gt.s32.totalorder %s1773_s13, 0 }
  0x13   : > { %s422_s14 = scalar_select %p421_p6, %s1769_s12, 15 }
  0x14   : > { %s1781_s17 = sshll.u32 %s2653_s28, 5  ;;  %v600_v4 = vsub.s32 0, %v1775_v1  ;;  %p1515_p8 = scmp.lt.s32.totalorder %s1773_s13, 15  ;;  %v620_v6 = vsub.s32 1, %v1775_v1  ;;  %v656_v7 = vsub.s32 2, %v1775_v1  ;;  %vm511_vm0 = vcmp.lt.s32.totalorder %v1775_v1, 1 }
  0x15   : > { %s1510_s20 = sshll.u32 %s422_s14, 1  ;;  %s1565_s24 = sadd.s32 8, %s1769_s12  ;;  %vm529_vm1 = vcmp.eq.s32.totalorder %v1775_v1, 0  ;;  %vm563_vm2 = vcmp.lt.s32.totalorder %v1775_v1, 7  ;;  %v1806_v9 = vadd.s32 8, %v1775_v1 }
  0x16   : > { %s425_s23 = sadd.s32 %s1781_s17, %s1510_s20  ;;  %p1797_p9 = scmp.lt.s32.totalorder %s1565_s24, 15  ;;  %v1803_v8 = vrot.slane %v475_v3, %v620_v6  ;;  %v1818_v10 = vrot.slane %v475_v3, %v600_v4  ;;  %v1820_v11 = vrot.slane %v475_v3, %v656_v7  ;;  %v1822_v12 = vrot.slane %v474_v2, %v600_v4 }
  0x17   : > { %s1512_s25 = sshll.u32 %s425_s23, 3  ;;  %v1824_v13 = vrot.slane %v476_v5, %v600_v4  ;;  %v1835_v16 = vrot.slane %v474_v2, %v620_v6  ;;  %v1837_v17 = vrot.slane %v474_v2, %v656_v7  ;;  %v1839_v18 = vrot.slane %v476_v5, %v620_v6  ;;  %p1534_p10 = scmp.le.s32.totalorder %s1673_s27, 0 }
  0x18   : > { %s1811_s12 = scalar_lea.vmem %s2560_s0, %s1512_s25  ;;  %s1816_s18 = scalar_lea.vmem %s2568_s8, %s1512_s25  ;;  %2572 = vst [vmem:[#allocation3_spill] sm:$0xff] %v1822_v12  ;;  %v1841_v19 = vrot.slane %v476_v5, %v656_v7  ;;  %vm581_vm4 = vcmp.eq.s32.totalorder %v1806_v9, 15 }
  0x19   : > { %s432_s19 = scalar_select %p431_p7, %s1773_s13, 0  ;;  %v1830_v14 = vld [vmem:[%s1811_s12 + $0x10] sm:$0xff]  ;;  %v1833_v15 = vld [vmem:[%s1811_s12 + $0x18] sm:$0xff]  ;;  %v1844_v20 = vld [vmem:[%s1811_s12 + $0x20] sm:$0xff] }
  0x1a   : > { %s2655_s24 = smov (!%p1797_p9, %s1565_s24), 15  ;;  %v494_v21 = vrot.slane %v1830_v14, 7  ;;  %v502_v22 = vrot.slane %v1833_v15, 7  ;;  %v548_v23 = vrot.slane %v1830_v14, 1  ;;  %v556_v24 = vrot.slane %v1833_v15, 1  ;;  %v1853_v25 = vld [vmem:[%s1811_s12 + $0x28] sm:$0xff] }
  0x1b   : > { %s2657_s19 = smov (!%p1515_p8, %s432_s19), 15  ;;  %v624_v26 = vmul.f32 %v1803_v8, %v1830_v14  ;;  %v495_v27 = vrot.slane %v1844_v20, 7  ;;  %v503_v28 = vrot.slane %v1853_v25, 7  ;;  %s2659_s24 = smov (!%p1797_p9, %s2655_s24), 15  ;;  %v625_v36 = vmul.f32 %v1803_v8, %v1833_v15  ;;  %v1935_v61 = vld [vmem:[%s1811_s12 + $0x30] sm:$0xff]  ;;  %v1955_v7 = vld [vmem:[%s1811_s12 + $0x38] sm:$0xff] }
  0x1c   : > { %v521_v29 = vsel %vm511_vm0, %v502_v22, %v494_v21  ;;  %v565_v30 = vsel %vm563_vm2, %v548_v23, %v556_v24  ;;  %v513_v31 = vsel %vm511_vm0, %v494_v21, %v502_v22  ;;  %v573_v32 = vsel %vm563_vm2, %v556_v24, %v548_v23  ;;  %s1520_s13 = sshll.u32 %s2657_s19, 1  ;;  %s1527_s21 = sshll.u32 %s2659_s24, 1 }
  0x1d   : > { %v533_v33 = vsel %vm529_vm1, 0.0, %v521_v29  ;;  %v660_v34 = vmul.f32 %v1820_v11, %v565_v30  ;;  %v1876_v35 = vmul.f32 %v1837_v17, %v565_v30  ;;  %s439_s20 = sadd.s32 %s1520_s13, %s1781_s17  ;;  %v1886_v39 = vmul.f32 %v1841_v19, %v565_v30  ;;  %s456_s23 = sadd.s32 %s1527_s21, %s1781_s17 }
  0x1e   : > { %v604_v37 = vmul.f32 %v1818_v10, %v533_v33  ;;  %v1883_v38 = vmul.f32 %v1822_v12, %v533_v33  ;;  %v585_v40 = vsel %vm581_vm4, 0.0, %v573_v32  ;;  %s1522_s22 = sshll.u32 %s439_s20, 3  ;;  %v1892_v41 = vmul.f32 %v1824_v13, %v533_v33  ;;  %s1529_s28 = sshll.u32 %s456_s23, 3 }
  0x1f   : > { %2573 = vst [vmem:[#allocation4_spill] sm:$0xff] %v1886_v39  ;;  %v605_v42 = vmul.f32 %v1818_v10, %v513_v31  ;;  %v661_v43 = vmul.f32 %v1820_v11, %v585_v40  ;;  %v1897_v44 = vmul.f32 %v1822_v12, %v513_v31  ;;  %s1902_s26 = scalar_lea.vmem %s2561_s1, %s1522_s22  ;;  %v1905_v46 = vmul.f32 %v1837_v17, %v585_v40  ;;  %s1915_s15 = scalar_lea.vmem %s2562_s2, %s1529_s28 }
  0x20   : > { %2574 = vst [vmem:[#allocation5_spill] sm:$0xff] %v1892_v41  ;;  %v640_v45 = vadd.f32 %v624_v26, %v604_v37  ;;  %v1908_v47 = vmul.f32 %v1824_v13, %v513_v31  ;;  %v522_v48 = vsel %vm511_vm0, %v503_v28, %v495_v27  ;;  %v549_v51 = vrot.slane %v1844_v20, 1  ;;  %v1964_v26 = vld [vmem:[%s1811_s12 + $0x40] sm:$0xff] }
  0x21   : > { %v641_v49 = vadd.f32 %v625_v36, %v605_v42  ;;  %v535_v50 = vsel %vm529_vm1, 0.0, %v522_v48  ;;  %v557_v52 = vrot.slane %v1853_v25, 1  ;;  %v1922_v54 = vmul.f32 %v1841_v19, %v585_v40 }
  0x22   : > { %2575 = vst [vmem:[#allocation6_spill] sm:$0xff] %v1908_v47  ;;  %v676_v53 = vadd.f32 %v660_v34, %v640_v45  ;;  %v606_v55 = vmul.f32 %v1818_v10, %v535_v50  ;;  %v626_v56 = vmul.f32 %v1803_v8, %v1844_v20  ;;  %v1930_v59 = vmul.f32 %v1822_v12, %v535_v50 }
  0x23   : > { %2576 = vst [vmem:[#allocation7_spill] sm:$0xff] %v1922_v54  ;;  %v677_v57 = vadd.f32 %v661_v43, %v641_v49  ;;  %v566_v58 = vsel %vm563_vm2, %v549_v51, %v557_v52  ;;  %v514_v60 = vsel %vm511_vm0, %v495_v27, %v503_v28  ;;  %v1943_v2 = vmul.f32 %v1824_v13, %v535_v50  ;;  %v1967_v27 = vld [vmem:[%s1811_s12 + $0x48] sm:$0xff] }
  0x24   : > { %693 = vst.msk [vmem:[#allocation2 + $0x10] sm:$0xff] %vm690_vm3, %v676_v53  ;;  %v642_v62 = vadd.f32 %v626_v56, %v606_v55  ;;  %v662_v63 = vmul.f32 %v1820_v11, %v566_v58  ;;  %v1940_v0 = vmul.f32 %v1837_v17, %v566_v58  ;;  %v1947_v3 = vmul.f32 %v1841_v19, %v566_v58 }
  0x25   : > { %2577 = vst [vmem:[#allocation8_spill] sm:$0xff] %v1943_v2  ;;  %694 = vst.msk [vmem:[#allocation2 + $0x18] sm:$0xff] %vm690_vm3, %v677_v57  ;;  %v574_v4 = vsel %vm563_vm2, %v557_v52, %v549_v51  ;;  %v607_v5 = vmul.f32 %v1818_v10, %v514_v60  ;;  %v627_v6 = vmul.f32 %v1803_v8, %v1853_v25  ;;  %v496_v24 = vrot.slane %v1935_v61, 7 }
  0x26   : > { %2578 = vst [vmem:[#allocation9_spill] sm:$0xff] %v1947_v3  ;;  %v678_v21 = vadd.f32 %v662_v63, %v642_v62  ;;  %v587_v22 = vsel %vm581_vm4, 0.0, %v574_v4  ;;  %v1960_v23 = vmul.f32 %v1822_v12, %v514_v60  ;;  %v1974_v31 = vmul.f32 %v1824_v13, %v514_v60 }
  0x27   : > { %v643_v28 = vadd.f32 %v627_v6, %v607_v5  ;;  %v663_v29 = vmul.f32 %v1820_v11, %v587_v22  ;;  %v1971_v30 = vmul.f32 %v1837_v17, %v587_v22  ;;  %v1978_v32 = vmul.f32 %v1841_v19, %v587_v22 }
  0x28   : > { %2579 = vst [vmem:[#allocation10_spill] sm:$0xff] %v1974_v31  ;;  %695 = vst.msk [vmem:[#allocation2 + $0x20] sm:$0xff] %vm690_vm3, %v678_v21  ;;  %v504_v33 = vrot.slane %v1955_v7, 7  ;;  %v550_v34 = vrot.slane %v1935_v61, 1  ;;  %v558_v36 = vrot.slane %v1955_v7, 1  ;;  %v628_v40 = vmul.f32 %v1803_v8, %v1935_v61 }
  0x29   : > { %2580 = vst [vmem:[#allocation11_spill] sm:$0xff] %v1978_v32  ;;  %v679_v37 = vadd.f32 %v663_v29, %v643_v28  ;;  %v497_v42 = vrot.slane %v1964_v26, 7  ;;  %v505_v43 = vrot.slane %v1967_v27, 7  ;;  %v629_v55 = vmul.f32 %v1803_v8, %v1955_v7 }
  0x2a   : > { %v523_v45 = vsel %vm511_vm0, %v504_v33, %v496_v24  ;;  %v567_v48 = vsel %vm563_vm2, %v550_v34, %v558_v36  ;;  %v515_v49 = vsel %vm511_vm0, %v496_v24, %v504_v33  ;;  %v575_v50 = vsel %vm563_vm2, %v558_v36, %v550_v34 }
  0x2b   : > { %696 = vst.msk [vmem:[#allocation2 + $0x28] sm:$0xff] %vm690_vm3, %v679_v37  ;;  %v537_v51 = vsel %vm529_vm1, 0.0, %v523_v45  ;;  %v664_v52 = vmul.f32 %v1820_v11, %v567_v48  ;;  %v2000_v53 = vmul.f32 %v1837_v17, %v567_v48  ;;  %v2009_v58 = vmul.f32 %v1841_v19, %v567_v48 }
  0x2c   : > { %v608_v56 = vmul.f32 %v1818_v10, %v537_v51  ;;  %v2006_v57 = vmul.f32 %v1822_v12, %v537_v51  ;;  %v589_v60 = vsel %vm581_vm4, 0.0, %v575_v50  ;;  %v2014_v62 = vmul.f32 %v1824_v13, %v537_v51 }
  0x2d   : > { %2581 = vst [vmem:[#allocation12_spill] sm:$0xff] %v2009_v58  ;;  %v609_v63 = vmul.f32 %v1818_v10, %v515_v49  ;;  %v665_v4 = vmul.f32 %v1820_v11, %v589_v60  ;;  %v2019_v5 = vmul.f32 %v1822_v12, %v515_v49  ;;  %v2022_v21 = vmul.f32 %v1837_v17, %v589_v60 }
  0x2e   : > { %2582 = vst [vmem:[#allocation13_spill] sm:$0xff] %v2014_v62  ;;  %v644_v6 = vadd.f32 %v628_v40, %v608_v56  ;;  %v2025_v22 = vmul.f32 %v1824_v13, %v515_v49  ;;  %v524_v24 = vsel %vm511_vm0, %v505_v43, %v497_v42  ;;  %v551_v33 = vrot.slane %v1964_v26, 1 }
  0x2f   : > { %v645_v28 = vadd.f32 %v629_v55, %v609_v63  ;;  %v539_v29 = vsel %vm529_vm1, 0.0, %v524_v24  ;;  %v559_v34 = vrot.slane %v1967_v27, 1  ;;  %v2034_v37 = vmul.f32 %v1841_v19, %v589_v60  ;;  %v2067_v24 = vld [vmem:[%s1811_s12 + $0x58] sm:$0xff] }
  0x30   : > { %2583 = vst [vmem:[#allocation14_spill] sm:$0xff] %v2025_v22  ;;  %v680_v36 = vadd.f32 %v664_v52, %v644_v6  ;;  %v610_v40 = vmul.f32 %v1818_v10, %v539_v29  ;;  %v630_v45 = vmul.f32 %v1803_v8, %v1964_v26  ;;  %v2042_v50 = vmul.f32 %v1822_v12, %v539_v29  ;;  %v2047_v52 = vld [vmem:[%s1811_s12 + $0x50] sm:$0xff] }
  0x31   : > { %2584 = vst [vmem:[#allocation15_spill] sm:$0xff] %v2034_v37  ;;  %v681_v48 = vadd.f32 %v665_v4, %v645_v28  ;;  %v568_v49 = vsel %vm563_vm2, %v551_v33, %v559_v34  ;;  %v516_v51 = vsel %vm511_vm0, %v497_v42, %v505_v43  ;;  %v2055_v63 = vmul.f32 %v1824_v13, %v539_v29 }
  0x32   : > { %697 = vst.msk [vmem:[#allocation2 + $0x30] sm:$0xff] %vm690_vm3, %v680_v36  ;;  %v646_v55 = vadd.f32 %v630_v45, %v610_v40  ;;  %v666_v56 = vmul.f32 %v1820_v11, %v568_v49  ;;  %v2052_v60 = vmul.f32 %v1837_v17, %v568_v49  ;;  %v2059_v4 = vmul.f32 %v1841_v19, %v568_v49  ;;  %v2076_v45 = vld [vmem:[%s1811_s12 + $0x60] sm:$0xff] }
  0x33   : > { %2586 = vst [vmem:[#allocation17_spill] sm:$0xff] %v2055_v63  ;;  %698 = vst.msk [vmem:[#allocation2 + $0x38] sm:$0xff] %vm690_vm3, %v681_v48  ;;  %v576_v42 = vsel %vm563_vm2, %v559_v34, %v551_v33  ;;  %v611_v43 = vmul.f32 %v1818_v10, %v516_v51  ;;  %v631_v6 = vmul.f32 %v1803_v8, %v1967_v27  ;;  %v498_v40 = vrot.slane %v2047_v52, 7  ;;  %v2079_v48 = vld [vmem:[%s1811_s12 + $0x68] sm:$0xff] }
  0x34   : > { %2585 = vst [vmem:[#allocation16_spill] sm:$0xff] %v2052_v60  ;;  %2587 = vst [vmem:[#allocation18_spill] sm:$0xff] %v2059_v4  ;;  %v682_v28 = vadd.f32 %v666_v56, %v646_v55  ;;  %v591_v29 = vsel %vm581_vm4, 0.0, %v576_v42  ;;  %v2072_v36 = vmul.f32 %v1822_v12, %v516_v51  ;;  %v2086_v55 = vmul.f32 %v1824_v13, %v516_v51 }
  0x35   : > { %v647_v33 = vadd.f32 %v631_v6, %v611_v43  ;;  %v667_v34 = vmul.f32 %v1820_v11, %v591_v29  ;;  %v2083_v49 = vmul.f32 %v1837_v17, %v591_v29  ;;  %v2090_v56 = vmul.f32 %v1841_v19, %v591_v29 }
  0x36   : > { %2589 = vst [vmem:[#allocation20_spill] sm:$0xff] %v2086_v55  ;;  %699 = vst.msk [vmem:[#allocation2 + $0x40] sm:$0xff] %vm690_vm3, %v682_v28  ;;  %v506_v42 = vrot.slane %v2067_v24, 7  ;;  %v552_v4 = vrot.slane %v2047_v52, 1  ;;  %v560_v37 = vrot.slane %v2067_v24, 1  ;;  %v632_v6 = vmul.f32 %v1803_v8, %v2047_v52 }
  0x37   : > { %2588 = vst [vmem:[#allocation19_spill] sm:$0xff] %v2083_v49  ;;  %2590 = vst [vmem:[#allocation21_spill] sm:$0xff] %v2090_v56  ;;  %v683_v43 = vadd.f32 %v667_v34, %v647_v33  ;;  %v499_v58 = vrot.slane %v2076_v45, 7  ;;  %v507_v51 = vrot.slane %v2079_v48, 7  ;;  %v633_v3 = vmul.f32 %v1803_v8, %v2067_v24 }
  0x38   : > { %v525_v28 = vsel %vm511_vm0, %v506_v42, %v498_v40  ;;  %v569_v29 = vsel %vm563_vm2, %v552_v4, %v560_v37  ;;  %v517_v56 = vsel %vm511_vm0, %v498_v40, %v506_v42  ;;  %v577_v55 = vsel %vm563_vm2, %v560_v37, %v552_v4 }
  0x39   : > { %700 = vst.msk [vmem:[#allocation2 + $0x48] sm:$0xff] %vm690_vm3, %v683_v43  ;;  %v541_v33 = vsel %vm529_vm1, 0.0, %v525_v28  ;;  %v668_v34 = vmul.f32 %v1820_v11, %v569_v29  ;;  %v2112_v32 = vmul.f32 %v1837_v17, %v569_v29  ;;  %v2121_v37 = vmul.f32 %v1841_v19, %v569_v29 }
  0x3a   : > { %v612_v63 = vmul.f32 %v1818_v10, %v541_v33  ;;  %v2118_v40 = vmul.f32 %v1822_v12, %v541_v33  ;;  %v593_v4 = vsel %vm581_vm4, 0.0, %v577_v55  ;;  %v2126_v42 = vmul.f32 %v1824_v13, %v541_v33 }
  0x3b   : > { %2591 = vst [vmem:[#allocation22_spill] sm:$0xff] %v2112_v32  ;;  %2593 = vst [vmem:[#allocation24_spill] sm:$0xff] %v2121_v37  ;;  %v613_v43 = vmul.f32 %v1818_v10, %v517_v56  ;;  %v669_v28 = vmul.f32 %v1820_v11, %v593_v4  ;;  %v2131_v22 = vmul.f32 %v1822_v12, %v517_v56  ;;  %v561_v2 = vrot.slane %v2079_v48, 1 }
  0x3c   : > { %2592 = vst [vmem:[#allocation23_spill] sm:$0xff] %v2118_v40  ;;  %2594 = vst [vmem:[#allocation25_spill] sm:$0xff] %v2126_v42  ;;  %v648_v62 = vadd.f32 %v632_v6, %v612_v63  ;;  %v2134_v31 = vmul.f32 %v1837_v17, %v593_v4  ;;  %v2137_v29 = vmul.f32 %v1824_v13, %v517_v56  ;;  %v553_v42 = vrot.slane %v2076_v45, 1 }
  0x3d   : > { %2595 = vst [vmem:[#allocation26_spill] sm:$0xff] %v2131_v22  ;;  %v526_v55 = vsel %vm511_vm0, %v507_v51, %v499_v58  ;;  %v649_v33 = vadd.f32 %v633_v3, %v613_v43  ;;  %v2146_v63 = vmul.f32 %v1841_v19, %v593_v4  ;;  %v634_v56 = vmul.f32 %v1803_v8, %v2076_v45 }
  0x3e   : > { %2596 = vst [vmem:[#allocation27_spill] sm:$0xff] %v2134_v31  ;;  %2597 = vst [vmem:[#allocation28_spill] sm:$0xff] %v2137_v29  ;;  %v543_v37 = vsel %vm529_vm1, 0.0, %v526_v55  ;;  %v684_v54 = vadd.f32 %v668_v34, %v648_v62  ;;  %v570_v3 = vsel %vm563_vm2, %v553_v42, %v561_v2  ;;  %v518_v55 = vsel %vm511_vm0, %v499_v58, %v507_v51  ;;  %v2159_v62 = vld [vmem:[%s1811_s12] sm:$0xff] }
  0x3f   : > { %2598 = vst [vmem:[#allocation29_spill] sm:$0xff] %v2146_v63  ;;  %v614_v6 = vmul.f32 %v1818_v10, %v543_v37  ;;  %v685_v29 = vadd.f32 %v669_v28, %v649_v33  ;;  %v2154_v43 = vmul.f32 %v1822_v12, %v543_v37  ;;  %v670_v4 = vmul.f32 %v1820_v11, %v570_v3 }
  0x40   : > { %701 = vst.msk [vmem:[#allocation2 + $0x50] sm:$0xff] %vm690_vm3, %v684_v54  ;;  %v2164_v28 = vmul.f32 %v1837_v17, %v570_v3  ;;  %v2167_v33 = vmul.f32 %v1824_v13, %v543_v37  ;;  %v2171_v63 = vmul.f32 %v1841_v19, %v570_v3  ;;  %v578_v58 = vsel %vm563_vm2, %v561_v2, %v553_v42  ;;  %v2186_v3 = vld [vmem:[%s1811_s12 + $0x70] sm:$0xff] }
  0x41   : > { %2599 = vst [vmem:[#allocation30_spill] sm:$0xff] %v2154_v43  ;;  %v650_v34 = vadd.f32 %v634_v56, %v614_v6  ;;  %702 = vst.msk [vmem:[#allocation2 + $0x58] sm:$0xff] %vm690_vm3, %v685_v29  ;;  %v615_v54 = vmul.f32 %v1818_v10, %v518_v55  ;;  %v635_v51 = vmul.f32 %v1803_v8, %v2079_v48  ;;  %v478_v6 = vld [vmem:[%s1811_s12 + $0x8] sm:$0xff]  ;;  %v595_v47 = vsel %vm581_vm4, 0.0, %v578_v58 }
  0x42   : > { %2600 = vst [vmem:[#allocation31_spill] sm:$0xff] %v2164_v28  ;;  %2601 = vst [vmem:[#allocation32_spill] sm:$0xff] %v2167_v33  ;;  %v2182_v37 = vmul.f32 %v1822_v12, %v518_v55  ;;  %v493_v29 = vrot.slane %v2159_v62, 7  ;;  %v671_v42 = vmul.f32 %v1820_v11, %v595_v47  ;;  %v2193_v33 = vmul.f32 %v1837_v17, %v595_v47 }
  0x43   : > { %2602 = vst [vmem:[#allocation33_spill] sm:$0xff] %v2171_v63  ;;  %v686_v56 = vadd.f32 %v670_v4, %v650_v34  ;;  %v2189_v63 = vld [vmem:[%s1811_s12 + $0x78] sm:$0xff]  ;;  %v651_v2 = vadd.f32 %v635_v51, %v615_v54  ;;  %v2196_v34 = vmul.f32 %v1824_v13, %v518_v55  ;;  %v501_v4 = vrot.slane %v478_v6, 7 }
  0x44   : > { %2603 = vst [vmem:[#allocation34_spill] sm:$0xff] %v2182_v37  ;;  %2604 = vst [vmem:[#allocation35_spill] sm:$0xff] %v2193_v33  ;;  %v547_v58 = vrot.slane %v2159_v62, 1  ;;  %v555_v39 = vrot.slane %v478_v6, 1  ;;  %v622_v28 = vmul.f32 %v1803_v8, %v2159_v62  ;;  %v623_v54 = vmul.f32 %v1803_v8, %v478_v6 }
  0x45   : > { %2605 = vst [vmem:[#allocation36_spill] sm:$0xff] %v2196_v34  ;;  %703 = vst.msk [vmem:[#allocation2 + $0x60] sm:$0xff] %vm690_vm3, %v686_v56  ;;  %v687_v31 = vadd.f32 %v671_v42, %v651_v2  ;;  %v500_v51 = vrot.slane %v2186_v3, 7  ;;  %v508_v32 = vrot.slane %v2189_v63, 7  ;;  %v520_v55 = vsel %vm511_vm0, %v501_v4, %v493_v29 }
  0x46   : > { %v564_v56 = vsel %vm563_vm2, %v547_v58, %v555_v39  ;;  %v512_v34 = vsel %vm511_vm0, %v493_v29, %v501_v4  ;;  %v572_v33 = vsel %vm563_vm2, %v555_v39, %v547_v58  ;;  %v2215_v2 = vmul.f32 %v1841_v19, %v595_v47 }
  0x47   : > { %704 = vst.msk [vmem:[#allocation2 + $0x68] sm:$0xff] %vm690_vm3, %v687_v31  ;;  %v531_v42 = vsel %vm529_vm1, 0.0, %v520_v55  ;;  %v658_v41 = vmul.f32 %v1820_v11, %v564_v56  ;;  %v583_v37 = vsel %vm581_vm4, 0.0, %v572_v33  ;;  %v776_v29 = vmul.f32 %v1837_v17, %v564_v56 }
  0x48   : > { %2606 = vst [vmem:[#allocation37_spill] sm:$0xff] %v2215_v2  ;;  %v602_v49 = vmul.f32 %v1818_v10, %v531_v42  ;;  %v603_v4 = vmul.f32 %v1818_v10, %v512_v34  ;;  %v659_v39 = vmul.f32 %v1820_v11, %v583_v37  ;;  %v726_v31 = vmul.f32 %v1822_v12, %v531_v42 }
  0x49   : > { %v727_v47 = vmul.f32 %v1822_v12, %v512_v34  ;;  %v527_v58 = vsel %vm511_vm0, %v508_v32, %v500_v51  ;;  %v554_v55 = vrot.slane %v2186_v3, 1  ;;  %v562_v56 = vrot.slane %v2189_v63, 1 }
  0x4a   : > { %v638_v2 = vadd.f32 %v622_v28, %v602_v49  ;;  %v639_v60 = vadd.f32 %v623_v54, %v603_v4  ;;  %v545_v33 = vsel %vm529_vm1, 0.0, %v527_v58  ;;  %v777_v43 = vmul.f32 %v1837_v17, %v583_v37 }
  0x4b   : > { %v616_v22 = vmul.f32 %v1818_v10, %v545_v33  ;;  %v636_v42 = vmul.f32 %v1803_v8, %v2186_v3  ;;  %v519_v34 = vsel %vm511_vm0, %v500_v51, %v508_v32  ;;  %v571_v49 = vsel %vm563_vm2, %v554_v55, %v562_v56 }
  0x4c   : > { %v674_v12 = vadd.f32 %v658_v41, %v638_v2  ;;  %v675_v40 = vadd.f32 %v659_v39, %v639_v60  ;;  %v579_v28 = vsel %vm563_vm2, %v562_v56, %v554_v55  ;;  %v672_v4 = vmul.f32 %v1820_v11, %v571_v49 }
  0x4d   : > { %v652_v54 = vadd.f32 %v636_v42, %v616_v22  ;;  %v2246_v37 = vmul.f32 %v1824_v13, %v545_v33  ;;  %v2250_v58 = vsel %vm581_vm4, 0.0, %v579_v28  ;;  %v2255_v41 = vmul.f32 %v1841_v19, %v571_v49  ;;  %v708_v42 = vld [vmem:[#allocation2 + $0x10] sm:$0xff] }
  0x4e   : > { %691 = vst.msk [vmem:[#allocation2] sm:$0xff] %vm690_vm3, %v674_v12  ;;  %692 = vst.msk [vmem:[#allocation2 + $0x8] sm:$0xff] %vm690_vm3, %v675_v40  ;;  %v617_v32 = vmul.f32 %v1818_v10, %v519_v34  ;;  %v637_v22 = vmul.f32 %v1803_v8, %v2189_v63  ;;  %v673_v60 = vmul.f32 %v1820_v11, %v2250_v58 }
  0x4f   : > { %v688_v51 = vadd.f32 %v672_v4, %v652_v54  ;;  %v2263_v2 = vmul.f32 %v1824_v13, %v519_v34  ;;  %v744_v12 = vmul.f32 %v1835_v16, %v2159_v62  ;;  %v745_v40 = vmul.f32 %v1835_v16, %v478_v6  ;;  %v709_v34 = vld [vmem:[#allocation2 + $0x18] sm:$0xff] }
  0x50   : > { %v653_v39 = vadd.f32 %v637_v22, %v617_v32  ;;  %v746_v55 = vmul.f32 %v1835_v16, %v1830_v14  ;;  %v747_v10 = vmul.f32 %v1835_v16, %v1833_v15  ;;  %v748_v8 = vmul.f32 %v1835_v16, %v1844_v20  ;;  %v710_v22 = vld [vmem:[#allocation2 + $0x20] sm:$0xff] }
  0x51   : > { %705 = vst.msk [vmem:[#allocation2 + $0x70] sm:$0xff] %vm690_vm3, %v688_v51  ;;  %v758_v11 = vadd.f32 %v744_v12, %v726_v31  ;;  %v759_v33 = vadd.f32 %v745_v40, %v727_v47  ;;  %v749_v56 = vmul.f32 %v1835_v16, %v1853_v25  ;;  %v750_v62 = vmul.f32 %v1835_v16, %v1935_v61  ;;  %v711_v31 = vld [vmem:[#allocation2 + $0x28] sm:$0xff]  ;;  %v712_v47 = vld [vmem:[#allocation2 + $0x30] sm:$0xff] }
  0x52   : > { %v689_v6 = vadd.f32 %v673_v60, %v653_v39  ;;  %v760_v49 = vadd.f32 %v746_v55, %v1883_v38  ;;  %v761_v28 = vadd.f32 %v747_v10, %v1897_v44  ;;  %v762_v54 = vadd.f32 %v748_v8, %v1930_v59  ;;  %v713_v44 = vld [vmem:[#allocation2 + $0x38] sm:$0xff]  ;;  %v714_v39 = vld [vmem:[#allocation2 + $0x40] sm:$0xff] }
  0x53   : > { %v790_v4 = vadd.f32 %v776_v29, %v758_v11  ;;  %v791_v32 = vadd.f32 %v777_v43, %v759_v33  ;;  %v763_v51 = vadd.f32 %v749_v56, %v1960_v23  ;;  %v764_v12 = vadd.f32 %v750_v62, %v2006_v57  ;;  %v715_v11 = vld [vmem:[#allocation2 + $0x48] sm:$0xff] }
  0x54   : > { %706 = vst.msk [vmem:[#allocation2 + $0x78] sm:$0xff] %vm690_vm3, %v689_v6  ;;  %v792_v60 = vadd.f32 %v1876_v35, %v760_v49  ;;  %v793_v40 = vadd.f32 %v1905_v46, %v761_v28  ;;  %v794_v38 = vadd.f32 %v1940_v0, %v762_v54  ;;  %v751_v59 = vmul.f32 %v1835_v16, %v1955_v7  ;;  %v716_v28 = vld [vmem:[#allocation2 + $0x50] sm:$0xff]  ;;  %v717_v54 = vld [vmem:[#allocation2 + $0x58] sm:$0xff] }
  0x55   : > { %v804_v43 = vadd.f32 %v790_v4, %v708_v42  ;;  %v805_v29 = vadd.f32 %v791_v32, %v709_v34  ;;  %v795_v55 = vadd.f32 %v1971_v30, %v763_v51  ;;  %v796_v23 = vadd.f32 %v2000_v53, %v764_v12  ;;  %v2607_v4 = vld [vmem:[#allocation23_spill] sm:$0xff]  ;;  %v2610_v12 = vld [vmem:[#allocation16_spill] sm:$0xff] }
  0x56   : > { %v806_v57 = vadd.f32 %v792_v60, %v710_v22  ;;  %v807_v10 = vadd.f32 %v793_v40, %v711_v31  ;;  %v808_v8 = vadd.f32 %v794_v38, %v712_v47  ;;  %v765_v35 = vadd.f32 %v751_v59, %v2019_v5  ;;  %v2608_v22 = vld [vmem:[#allocation26_spill] sm:$0xff]  ;;  %v719_v38 = vld [vmem:[#allocation2 + $0x68] sm:$0xff] }
  0x57   : > { %818 = vst.msk [vmem:[#allocation2 + $0x10] sm:$0xff] %vm690_vm3, %v804_v43  ;;  %819 = vst.msk [vmem:[#allocation2 + $0x18] sm:$0xff] %vm690_vm3, %v805_v29  ;;  %v809_v46 = vadd.f32 %v795_v55, %v713_v44  ;;  %v810_v0 = vadd.f32 %v796_v23, %v714_v39  ;;  %v752_v33 = vmul.f32 %v1835_v16, %v1964_v26  ;;  %v2609_v47 = vld [vmem:[#allocation30_spill] sm:$0xff]  ;;  %v2613_v43 = vld [vmem:[#allocation5_spill] sm:$0xff] }
  0x58   : > { %v753_v30 = vmul.f32 %v1835_v16, %v1967_v27  ;;  %820 = vst.msk [vmem:[#allocation2 + $0x20] sm:$0xff] %vm690_vm3, %v806_v57  ;;  %821 = vst.msk [vmem:[#allocation2 + $0x28] sm:$0xff] %vm690_vm3, %v807_v10  ;;  %v797_v53 = vadd.f32 %v2022_v21, %v765_v35  ;;  %v754_v5 = vmul.f32 %v1835_v16, %v2047_v52  ;;  %v720_v44 = vld [vmem:[#allocation2 + $0x70] sm:$0xff]  ;;  %v2612_v39 = vld [vmem:[#allocation34_spill] sm:$0xff] }
  0x59   : > { %822 = vst.msk [vmem:[#allocation2 + $0x30] sm:$0xff] %vm690_vm3, %v808_v8  ;;  %v755_v56 = vmul.f32 %v1835_v16, %v2067_v24  ;;  %v756_v62 = vmul.f32 %v1835_v16, %v2076_v45  ;;  %823 = vst.msk [vmem:[#allocation2 + $0x38] sm:$0xff] %vm690_vm3, %v809_v46  ;;  %v766_v6 = vadd.f32 %v752_v33, %v2042_v50  ;;  %v2611_v50 = vld [vmem:[#allocation19_spill] sm:$0xff]  ;;  %v2614_v29 = vld [vmem:[#allocation22_spill] sm:$0xff] }
  0x5a   : > { %824 = vst.msk [vmem:[#allocation2 + $0x40] sm:$0xff] %vm690_vm3, %v810_v0  ;;  %v767_v42 = vadd.f32 %v753_v30, %v2072_v36  ;;  %v757_v21 = vmul.f32 %v1835_v16, %v2079_v48  ;;  %v868_v34 = vmul.f32 %v1839_v18, %v1830_v14  ;;  %v811_v49 = vadd.f32 %v797_v53, %v715_v11  ;;  %v718_v36 = vld [vmem:[#allocation2 + $0x60] sm:$0xff] }
  0x5b   : > { %v768_v32 = vadd.f32 %v754_v5, %v2607_v4  ;;  %v769_v31 = vadd.f32 %v755_v56, %v2608_v22  ;;  %v770_v51 = vadd.f32 %v756_v62, %v2609_v47  ;;  %v798_v60 = vadd.f32 %v2610_v12, %v766_v6  ;;  %v2615_v23 = vld [vmem:[#allocation27_spill] sm:$0xff]  ;;  %v721_v35 = vld [vmem:[#allocation2 + $0x78] sm:$0xff]  ;;  %v2618_v5 = vld [vmem:[#allocation4_spill] sm:$0xff] }
  0x5c   : > { %v799_v40 = vadd.f32 %v2611_v50, %v767_v42  ;;  %v771_v59 = vadd.f32 %v757_v21, %v2612_v39  ;;  %v882_v14 = vadd.f32 %v868_v34, %v2613_v43  ;;  %825 = vst.msk [vmem:[#allocation2 + $0x48] sm:$0xff] %vm690_vm3, %v811_v49  ;;  %v2616_v10 = vld [vmem:[#allocation31_spill] sm:$0xff]  ;;  %v869_v0 = vmul.f32 %v1839_v18, %v1833_v15  ;;  %v2619_v21 = vld [vmem:[#allocation6_spill] sm:$0xff] }
  0x5d   : > { %v800_v55 = vadd.f32 %v2614_v29, %v768_v32  ;;  %v801_v57 = vadd.f32 %v2615_v23, %v769_v31  ;;  %v802_v8 = vadd.f32 %v2616_v10, %v770_v51  ;;  %v832_v46 = vld [vmem:[#allocation2] sm:$0xff]  ;;  %v812_v11 = vadd.f32 %v798_v60, %v716_v28  ;;  %v833_v32 = vld [vmem:[#allocation2 + $0x8] sm:$0xff]  ;;  %v2622_v12 = vld [vmem:[#allocation10_spill] sm:$0xff] }
  0x5e   : > { %v813_v33 = vadd.f32 %v799_v40, %v717_v54  ;;  %v2617_v30 = vld [vmem:[#allocation35_spill] sm:$0xff]  ;;  %v914_v56 = vadd.f32 %v2618_v5, %v882_v14  ;;  %v883_v34 = vadd.f32 %v869_v0, %v2619_v21  ;;  %v870_v15 = vmul.f32 %v1839_v18, %v1844_v20  ;;  %v2626_v14 = vld [vmem:[#allocation9_spill] sm:$0xff]  ;;  %v2630_v0 = vld [vmem:[#allocation12_spill] sm:$0xff] }
  0x5f   : > { %v803_v53 = vadd.f32 %v2617_v30, %v771_v59  ;;  %v814_v62 = vadd.f32 %v800_v55, %v718_v36  ;;  %v815_v6 = vadd.f32 %v801_v57, %v719_v38  ;;  %v816_v42 = vadd.f32 %v802_v8, %v720_v44  ;;  %826 = vst.msk [vmem:[#allocation2 + $0x50] sm:$0xff] %vm690_vm3, %v812_v11  ;;  %v2620_v54 = vld [vmem:[#allocation7_spill] sm:$0xff]  ;;  %v834_v36 = vld [vmem:[#allocation2 + $0x10] sm:$0xff]  ;;  %v837_v10 = vld [vmem:[#allocation2 + $0x28] sm:$0xff] }
  0x60   : > { %827 = vst.msk [vmem:[#allocation2 + $0x58] sm:$0xff] %vm690_vm3, %v813_v33  ;;  %v928_v4 = vadd.f32 %v914_v56, %v832_v46  ;;  %v871_v28 = vmul.f32 %v1839_v18, %v1853_v25  ;;  %v915_v22 = vadd.f32 %v2620_v54, %v883_v34  ;;  %v872_v31 = vmul.f32 %v1839_v18, %v1935_v61  ;;  %v2621_v25 = vld [vmem:[#allocation8_spill] sm:$0xff]  ;;  %v2623_v38 = vld [vmem:[#allocation13_spill] sm:$0xff]  ;;  %v2627_v55 = vld [vmem:[#allocation11_spill] sm:$0xff] }
  0x61   : > { %v817_v49 = vadd.f32 %v803_v53, %v721_v35  ;;  %828 = vst.msk [vmem:[#allocation2 + $0x60] sm:$0xff] %vm690_vm3, %v814_v62  ;;  %829 = vst.msk [vmem:[#allocation2 + $0x68] sm:$0xff] %vm690_vm3, %v815_v6  ;;  %v873_v47 = vmul.f32 %v1839_v18, %v1955_v7  ;;  %v874_v20 = vmul.f32 %v1839_v18, %v1964_v26  ;;  %v835_v7 = vld [vmem:[#allocation2 + $0x18] sm:$0xff]  ;;  %v2625_v59 = vld [vmem:[#allocation17_spill] sm:$0xff] }
  0x62   : > { %830 = vst.msk [vmem:[#allocation2 + $0x70] sm:$0xff] %vm690_vm3, %v816_v42  ;;  %942 = vst.msk [vmem:[#allocation2] sm:$0xff] %vm690_vm3, %v928_v4  ;;  %v884_v51 = vadd.f32 %v870_v15, %v2621_v25  ;;  %v885_v60 = vadd.f32 %v871_v28, %v2622_v12  ;;  %v875_v50 = vmul.f32 %v1839_v18, %v1967_v27  ;;  %v2624_v26 = vld [vmem:[#allocation14_spill] sm:$0xff]  ;;  %v836_v57 = vld [vmem:[#allocation2 + $0x20] sm:$0xff] }
  0x63   : > { %831 = vst.msk [vmem:[#allocation2 + $0x78] sm:$0xff] %vm690_vm3, %v817_v49  ;;  %v876_v61 = vmul.f32 %v1839_v18, %v2047_v52  ;;  %v929_v40 = vadd.f32 %v915_v22, %v833_v32  ;;  %v886_v44 = vadd.f32 %v872_v31, %v2623_v38  ;;  %v887_v39 = vadd.f32 %v873_v47, %v2624_v26  ;;  %v838_v8 = vld [vmem:[#allocation2 + $0x30] sm:$0xff]  ;;  %v2628_v27 = vld [vmem:[#allocation20_spill] sm:$0xff]  ;;  %v2631_v33 = vld [vmem:[#allocation15_spill] sm:$0xff] }
  0x64   : > { %v888_v43 = vadd.f32 %v874_v20, %v2625_v59  ;;  %v916_v29 = vadd.f32 %v2626_v14, %v884_v51  ;;  %v917_v23 = vadd.f32 %v2627_v55, %v885_v60  ;;  %v889_v35 = vadd.f32 %v875_v50, %v2628_v27  ;;  %v2629_v46 = vld [vmem:[#allocation25_spill] sm:$0xff]  ;;  %v2632_v53 = vld [vmem:[#allocation18_spill] sm:$0xff]  ;;  %v840_v62 = vld [vmem:[#allocation2 + $0x40] sm:$0xff] }
  0x65   : > { %v890_v52 = vadd.f32 %v876_v61, %v2629_v46  ;;  %943 = vst.msk [vmem:[#allocation2 + $0x8] sm:$0xff] %vm690_vm3, %v929_v40  ;;  %v918_v11 = vadd.f32 %v2630_v0, %v886_v44  ;;  %v919_v30 = vadd.f32 %v2631_v33, %v887_v39  ;;  %v839_v56 = vld [vmem:[#allocation2 + $0x38] sm:$0xff]  ;;  %v877_v6 = vmul.f32 %v1839_v18, %v2067_v24  ;;  %v2633_v34 = vld [vmem:[#allocation21_spill] sm:$0xff]  ;;  %v2634_v4 = vld [vmem:[#allocation24_spill] sm:$0xff] }
  0x66   : > { %v920_v5 = vadd.f32 %v2632_v53, %v888_v43  ;;  %v930_v42 = vadd.f32 %v916_v29, %v834_v36  ;;  %v931_v21 = vadd.f32 %v917_v23, %v835_v7  ;;  %v921_v49 = vadd.f32 %v2633_v34, %v889_v35  ;;  %v2635_v22 = vld [vmem:[#allocation28_spill] sm:$0xff]  ;;  %v2636_v60 = vld [vmem:[#allocation29_spill] sm:$0xff] }
  0x67   : > { %v922_v32 = vadd.f32 %v2634_v4, %v890_v52  ;;  %v932_v15 = vadd.f32 %v918_v11, %v836_v57  ;;  %v933_v28 = vadd.f32 %v919_v30, %v837_v10  ;;  %v891_v31 = vadd.f32 %v877_v6, %v2635_v22  ;;  %v841_v25 = vld [vmem:[#allocation2 + $0x48] sm:$0xff]  ;;  %v842_v38 = vld [vmem:[#allocation2 + $0x50] sm:$0xff]  ;;  %v843_v44 = vld [vmem:[#allocation2 + $0x58] sm:$0xff] }
  0x68   : > { %v934_v54 = vadd.f32 %v920_v5, %v838_v8  ;;  %944 = vst.msk [vmem:[#allocation2 + $0x10] sm:$0xff] %vm690_vm3, %v930_v42  ;;  %945 = vst.msk [vmem:[#allocation2 + $0x18] sm:$0xff] %vm690_vm3, %v931_v21  ;;  %v935_v47 = vadd.f32 %v921_v49, %v839_v56  ;;  %v878_v24 = vmul.f32 %v1839_v18, %v2076_v45  ;;  %v2638_v40 = vld [vmem:[#allocation36_spill] sm:$0xff]  ;;  %v2639_v59 = vld [vmem:[#allocation33_spill] sm:$0xff] }
  0x69   : > { %v936_v20 = vadd.f32 %v922_v32, %v840_v62  ;;  %v879_v51 = vmul.f32 %v1839_v18, %v2079_v48  ;;  %v913_v12 = vmul.f32 %v1841_v19, %v2250_v58  ;;  %946 = vst.msk [vmem:[#allocation2 + $0x20] sm:$0xff] %vm690_vm3, %v932_v15  ;;  %947 = vst.msk [vmem:[#allocation2 + $0x28] sm:$0xff] %vm690_vm3, %v933_v28  ;;  %v2637_v48 = vld [vmem:[#allocation32_spill] sm:$0xff]  ;;  %v2640_v43 = vld [vmem:[#allocation37_spill] sm:$0xff] }
  0x6a   : > { %948 = vst.msk [vmem:[#allocation2 + $0x30] sm:$0xff] %vm690_vm3, %v934_v54  ;;  %v923_v50 = vadd.f32 %v2636_v60, %v891_v31  ;;  %v880_v61 = vmul.f32 %v1839_v18, %v2186_v3  ;;  %v881_v45 = vmul.f32 %v1839_v18, %v2189_v63  ;;  %949 = vst.msk [vmem:[#allocation2 + $0x38] sm:$0xff] %vm690_vm3, %v935_v47  ;;  %v844_v63 = vld [vmem:[#allocation2 + $0x60] sm:$0xff]  ;;  %v845_v29 = vld [vmem:[#allocation2 + $0x68] sm:$0xff] }
  0x6b   : > { %950 = vst.msk [vmem:[#allocation2 + $0x40] sm:$0xff] %vm690_vm3, %v936_v20  ;;  %v892_v58 = vadd.f32 %v878_v24, %v2637_v48  ;;  %v893_v36 = vadd.f32 %v879_v51, %v2638_v40  ;;  %v2641_v6 = vld [vmem:[#allocation3_spill] sm:$0xff] (!%p1534_p10) }
  0x6c   : > { %v937_v7 = vadd.f32 %v923_v50, %v841_v25  ;;  %v894_v26 = vadd.f32 %v880_v61, %v2246_v37  ;;  %v895_v39 = vadd.f32 %v881_v45, %v2263_v2  ;;  %959 = sbr.rel (%p1534_p10) target bundleno = 124 (0x7c), region = 56  ;;  %v960_v37 = vld [vmem:[%s1902_s26] sm:$0xff] (!%p1534_p10)  ;;  %v975_v32 = vld [vmem:[#allocation2 + $0x8] sm:$0xff] (!%p1534_p10) }
  0x6d   : > { %v924_v3 = vadd.f32 %v2639_v59, %v892_v58  ;;  %v925_v14 = vadd.f32 %v2640_v43, %v893_v36  ;;  %v962_v2 = vrot.slane (!%p1534_p10), %v960_v37, 7  ;;  %v968_v46 = vrot.slane (!%p1534_p10), %v960_v37, 1  ;;  %v974_v15 = vld [vmem:[#allocation2] sm:$0xff] (!%p1534_p10) }
  0x6e   : > { %951 = vst.msk [vmem:[#allocation2 + $0x48] sm:$0xff] %vm690_vm3, %v937_v7  ;;  %v926_v55 = vadd.f32 %v2255_v41, %v894_v26  ;;  %v927_v23 = vadd.f32 %v913_v12, %v895_v39  ;;  %v961_v41 = vld [vmem:[%s1902_s26 + $0x8] sm:$0xff] (!%p1534_p10)  ;;  %v978_v0 = vmul.f32 (!%p1534_p10), %v960_v37, %v1835_v16 }
  0x6f   : > { %v938_v57 = vadd.f32 %v924_v3, %v842_v38  ;;  %v939_v10 = vadd.f32 %v925_v14, %v843_v44  ;;  %v963_v35 = vrot.slane (!%p1534_p10), %v961_v41, 7  ;;  %v969_v52 = vrot.slane (!%p1534_p10), %v961_v41, 1 }
  0x70   : > { %v940_v8 = vadd.f32 %v926_v55, %v844_v63  ;;  %v941_v27 = vadd.f32 %v927_v23, %v845_v29  ;;  %v979_v11 = vmul.f32 (!%p1534_p10), %v961_v41, %v1835_v16 }
  0x71   : > { %952 = vst.msk [vmem:[#allocation2 + $0x50] sm:$0xff] %vm690_vm3, %v938_v57  ;;  %953 = vst.msk [vmem:[#allocation2 + $0x58] sm:$0xff] %vm690_vm3, %v939_v10  ;;  %v965_v33 = vsel (!%p1534_p10), %vm511_vm0, %v963_v35, %v962_v2  ;;  %v970_v30 = vsel (!%p1534_p10), %vm563_vm2, %v968_v46, %v969_v52  ;;  %v964_v53 = vsel (!%p1534_p10), %vm511_vm0, %v962_v2, %v963_v35 }
  0x72   : > { %954 = vst.msk [vmem:[#allocation2 + $0x60] sm:$0xff] %vm690_vm3, %v940_v8  ;;  %955 = vst.msk [vmem:[#allocation2 + $0x68] sm:$0xff] %vm690_vm3, %v941_v27  ;;  %v971_v5 = vsel (!%p1534_p10), %vm563_vm2, %v969_v52, %v968_v46  ;;  %v966_v56 = vsel (!%p1534_p10), %vm529_vm1, 0.0, %v965_v33  ;;  %v977_v16 = vmul.f32 (!%p1534_p10), %v964_v53, %v2641_v6  ;;  %v982_v21 = vmul.f32 (!%p1534_p10), %v970_v30, %v1837_v17 }
  0x73   : > { %v973_v62 = vsel %vm581_vm4, 0.0, %v971_v5  ;;  %v976_v42 = vmul.f32 %v966_v56, %v2641_v6 }
  0x74   : > { %v983_v34 = vmul.f32 %v973_v62, %v1837_v17  ;;  %v981_v49 = vadd.f32 %v979_v11, %v977_v16 }
  0x75   : > { %v980_v4 = vadd.f32 %v978_v0, %v976_v42 }
  0x76   : > { %v985_v28 = vadd.f32 %v983_v34, %v981_v49 }
  0x77   : > { %v984_v54 = vadd.f32 %v982_v21, %v980_v4 }
  0x78   : > { %v987_v22 = vadd.f32 %v985_v28, %v975_v32 }
  0x79   : > { %v986_v31 = vadd.f32 %v984_v54, %v974_v15 }
  0x7a   : > { %989 = vst.msk [vmem:[#allocation2 + $0x8] sm:$0xff] %vm690_vm3, %v987_v22 }
  0x7b   : > { %988 = vst.msk [vmem:[#allocation2] sm:$0xff] %vm690_vm3, %v986_v31 }
  0x7c PF: > { %p1535_p11 = scmp.ge.s32.totalorder %s1673_s27, 1 }
  0x7d   : > { %v994_v47 = vld [vmem:[%s1915_s15] sm:$0xff] (!%p1535_p11)  ;;  %v995_v17 = vld [vmem:[%s1915_s15 + $0x8] sm:$0xff] (!%p1535_p11)  ;;  %v1010_v39 = vld [vmem:[#allocation2 + $0x78] sm:$0xff] (!%p1535_p11) }
  0x7e   : > { %993 = sbr.rel (%p1535_p11) target bundleno = 139 (0x8b), region = 60  ;;  %v996_v20 = vrot.slane (!%p1535_p11), %v994_v47, 7  ;;  %v997_v25 = vrot.slane (!%p1535_p11), %v995_v17, 7  ;;  %v1002_v24 = vrot.slane (!%p1535_p11), %v994_v47, 1  ;;  %v1003_v51 = vrot.slane (!%p1535_p11), %v995_v17, 1  ;;  %v1009_v59 = vld [vmem:[#allocation2 + $0x70] sm:$0xff] (!%p1535_p11) }
  0x7f   : > { %v1013_v12 = vmul.f32 (!%p1535_p11), %v994_v47, %v1839_v18  ;;  %v1014_v60 = vmul.f32 (!%p1535_p11), %v995_v17, %v1839_v18 }
  0x80   : > { %v999_v50 = vsel (!%p1535_p11), %vm511_vm0, %v997_v25, %v996_v20  ;;  %v1004_v61 = vsel (!%p1535_p11), %vm563_vm2, %v1002_v24, %v1003_v51  ;;  %v998_v45 = vsel (!%p1535_p11), %vm511_vm0, %v996_v20, %v997_v25  ;;  %v1005_v48 = vsel (!%p1535_p11), %vm563_vm2, %v1003_v51, %v1002_v24 }
  0x81   : > { %v1000_v58 = vsel (!%p1535_p11), %vm529_vm1, 0.0, %v999_v50  ;;  %v1007_v40 = vsel (!%p1535_p11), %vm581_vm4, 0.0, %v1005_v48  ;;  %v1012_v18 = vmul.f32 (!%p1535_p11), %v998_v45, %v1824_v13  ;;  %v1017_v7 = vmul.f32 (!%p1535_p11), %v1004_v61, %v1841_v19 }
  0x82   : > { %v1011_v36 = vmul.f32 (!%p1535_p11), %v1000_v58, %v1824_v13  ;;  %v1018_v38 = vmul.f32 (!%p1535_p11), %v1007_v40, %v1841_v19 }
  0x83   : > { %v1016_v44 = vadd.f32 (!%p1535_p11), %v1014_v60, %v1012_v18 }
  0x84   : > { %v1015_v26 = vadd.f32 (!%p1535_p11), %v1013_v12, %v1011_v36 }
  0x85   : > { %v1020_v3 = vadd.f32 %v1018_v38, %v1016_v44 }
  0x86   : > { %v1019_v43 = vadd.f32 %v1017_v7, %v1015_v26 }
  0x87   : > { %v1022_v14 = vadd.f32 %v1020_v3, %v1010_v39 }
  0x88   : > { %v1021_v1 = vadd.f32 %v1019_v43, %v1009_v59 }
  0x89   : > { %1024 = vst.msk [vmem:[#allocation2 + $0x78] sm:$0xff] %vm690_vm3, %v1022_v14 }
  0x8a   : > { %1023 = vst.msk [vmem:[#allocation2 + $0x70] sm:$0xff] %vm690_vm3, %v1021_v1 }
  0x8b PF: > { %v1080_v9 = vld [vmem:[%s2565_s5] sm:$0xf]  ;;  %vm1129_vm5 = vcmask 1043456   ;;  %v1026_v55 = vld [vmem:[#allocation2 + $0x8] sm:$0xff]  ;;  %v1027_v27 = vld [vmem:[#allocation2 + $0x10] sm:$0xff]  ;;  %vm1340_vm6 = vcmask 64512  }
  0x8c   : > { %v1025_v13 = vld [vmem:[#allocation2] sm:$0xff]  ;;  %1583 = vmatprep.subr.msk.mxu0 %vm1129_vm5, %v1080_v9  ;;  %1609 = vmatprep.subr.msk.mxu1 %vm1129_vm5, %v1080_v9  ;;  %v1034_v23 = vld [vmem:[#allocation2 + $0x48] sm:$0xff]  ;;  %v1035_v37 = vld [vmem:[#allocation2 + $0x50] sm:$0xff] }
  0x8d   : > { %v1536_v19 = vld [vmem:[%s2564_s4] ss:$0 sm:$0xff]  ;;  %1584 = vmatpush3.msk.msra.mxu0 %vm1129_vm5, %v1080_v9  ;;  %1610 = vmatpush3.msk.msra.mxu1 %vm1129_vm5, %v1080_v9  ;;  %v1028_v41 = vld [vmem:[#allocation2 + $0x18] sm:$0xff]  ;;  %v1030_v62 = vld [vmem:[#allocation2 + $0x28] sm:$0xff] }
  0x8e   : > { %v1048_v63 = vadd.f32 %v1536_v19, %v1025_v13  ;;  %v1033_v29 = vld [vmem:[#allocation2 + $0x40] sm:$0xff]  ;;  %v1049_v10 = vadd.f32 %v1536_v19, %v1026_v55  ;;  %v1057_v8 = vadd.f32 %v1536_v19, %v1034_v23  ;;  %v1050_v35 = vadd.f32 %v1536_v19, %v1027_v27  ;;  %v1036_v0 = vld [vmem:[#allocation2 + $0x58] sm:$0xff]  ;;  %v1038_v6 = vld [vmem:[#allocation2 + $0x68] sm:$0xff] }
  0x8f   : > { %v1056_v57 = vadd.f32 %v1536_v19, %v1033_v29  ;;  %v1058_v46 = vadd.f32 %v1536_v19, %v1035_v37  ;;  %v1051_v52 = vadd.f32 %v1536_v19, %v1028_v41  ;;  %v1029_v11 = vld [vmem:[#allocation2 + $0x20] sm:$0xff]  ;;  %v1059_v56 = vadd.f32 %v1536_v19, %v1036_v0  ;;  %v1031_v16 = vld [vmem:[#allocation2 + $0x30] sm:$0xff]  ;;  %v1032_v47 = vld [vmem:[#allocation2 + $0x38] sm:$0xff] }
  0x90   : > { %v1064_v2 = vmax.f32 %v1048_v63, 0.0  ;;  %v1037_v33 = vld [vmem:[#allocation2 + $0x60] sm:$0xff]  ;;  %v1065_v53 = vmax.f32 %v1049_v10, 0.0  ;;  %v1073_v5 = vmax.f32 %v1057_v8, 0.0  ;;  %v1066_v42 = vmax.f32 %v1050_v35, 0.0  ;;  %v1040_v25 = vld [vmem:[#allocation2 + $0x78] sm:$0xff] }
  0x91   : > { %v1072_v30 = vmax.f32 %v1056_v57, 0.0  ;;  %v1074_v21 = vmax.f32 %v1058_v46, 0.0  ;;  %v1052_v34 = vadd.f32 %v1536_v19, %v1029_v11  ;;  %v1039_v49 = vld [vmem:[#allocation2 + $0x70] sm:$0xff]  ;;  %v1067_v4 = vmax.f32 %v1051_v52, 0.0  ;;  %v2474_v58 = vld [vmem:[%s2566_s6] ss:$0 sm:$0xff] }
  0x92   : > { %1585 = vmatprep.mubr.msk.f32.mxu0 %vm690_vm3, %v1064_v2  ;;  %v1060_v32 = vadd.f32 %v1536_v19, %v1037_v33  ;;  %v1053_v15 = vadd.f32 %v1536_v19, %v1030_v62  ;;  %v1075_v28 = vmax.f32 %v1059_v56, 0.0  ;;  %v1061_v22 = vadd.f32 %v1536_v19, %v1038_v6  ;;  %v2479_v18 = vld [vmem:[%s2567_s7] ss:$0 sm:$0xff] }
  0x93   : > { %1597 = vmatprep.mubr.msk.f32.mxu1 %vm690_vm3, %v1072_v30  ;;  %1586 = vmatmul.mubr.msk.f32.vlgmr.msra.gmra.mrb[0].mxu0 %vm690_vm3, %v1065_v53  ;;  %v1068_v54 = vmax.f32 %v1052_v34, 0.0  ;;  %v1054_v31 = vadd.f32 %v1536_v19, %v1031_v16  ;;  %v1062_v20 = vadd.f32 %v1536_v19, %v1039_v49  ;;  %v1055_v51 = vadd.f32 %v1536_v19, %v1032_v47 }
  0x94   : > { %1598 = vmatmul.mubr.msk.f32.vlgmr.msra.gmra.mrb[0].mxu1 %vm690_vm3, %v1073_v5  ;;  %1588 = vmatprep.mubr.msk.f32.mxu0 %vm690_vm3, %v1066_v42  ;;  %v1076_v17 = vmax.f32 %v1060_v32, 0.0  ;;  %v1069_v24 = vmax.f32 %v1053_v15, 0.0  ;;  %v1077_v12 = vmax.f32 %v1061_v22, 0.0  ;;  %v1063_v50 = vadd.f32 %v1536_v19, %v1040_v25 }
  0x95   : > { %1600 = vmatprep.mubr.msk.f32.mxu1 %vm690_vm3, %v1074_v21  ;;  %v1070_v60 = vmax.f32 %v1054_v31, 0.0  ;;  %v1078_v61 = vmax.f32 %v1062_v20, 0.0  ;;  %v1071_v45 = vmax.f32 %v1055_v51, 0.0 }
  0x96   : > { %v1079_v48 = vmax.f32 %v1063_v50, 0.0 }
  0x97   : > { %1589 = vmatmul.mubr.msk.f32.gmra.mrb[2].mxu0 %vm690_vm3, %v1067_v4 }
  0x98   : > { %1601 = vmatmul.mubr.msk.f32.gmra.mrb[2].mxu1 %vm690_vm3, %v1075_v28  ;;  %1591 = vmatprep.mubr.msk.f32.mxu0 %vm690_vm3, %v1068_v54 }
  0x99   : > { %1603 = vmatprep.mubr.msk.f32.mxu1 %vm690_vm3, %v1076_v17 }
  0x9b   : > { %1592 = vmatmul.mubr.msk.f32.gmra.mrb[4].mxu0 %vm690_vm3, %v1069_v24 }
  0x9c   : > { %1604 = vmatmul.mubr.msk.f32.gmra.mrb[4].mxu1 %vm690_vm3, %v1077_v12  ;;  %1594 = vmatprep.mubr.msk.f32.mxu0 %vm690_vm3, %v1070_v60 }
  0x9d   : > { %1606 = vmatprep.mubr.msk.f32.mxu1 %vm690_vm3, %v1078_v61 }
  0x9f   : > { %1595 = vmatmul.mubr.msk.f32.gmra.mrb[6].mxu0 %vm690_vm3, %v1071_v45 }
  0xa0   : > { %1607 = vmatmul.mubr.msk.f32.gmra.mrb[6].mxu1 %vm690_vm3, %v1079_v48 }
 0x166   : > { %v1587_v40 = vpop.f32.mrb[0].mxu0 }
 0x167   : > { %v1286_v36 = vmul.f32 %v1587_v40, %v2474_v58  ;;  %v1599_v7 = vpop.f32.mrb[0].mxu1  ;;  %v1199_v38 = vpop.f32.mrb[1].mxu0 }
 0x168   : > { %v1294_v44 = vmul.f32 %v1599_v7, %v2474_v58  ;;  %v1285_v26 = vmul.f32 %v2474_v58, %v1199_v38  ;;  %v1239_v39 = vpop.f32.mrb[1].mxu1 }
 0x169   : > { %v1309_v59 = vadd.f32 %v2479_v18, %v1286_v36  ;;  %v1293_v3 = vmul.f32 %v2474_v58, %v1239_v39 }
 0x16a   : > { %v1317_v43 = vadd.f32 %v2479_v18, %v1294_v44  ;;  %v1308_v14 = vadd.f32 %v2479_v18, %v1285_v26  ;;  %v1590_v1 = vpop.f32.mrb[2].mxu0 }
 0x16b   : > { %v1325_v9 = vmax.f32 %v1309_v59, 0.0  ;;  %v1316_v13 = vadd.f32 %v2479_v18, %v1293_v3  ;;  %v1288_v19 = vmul.f32 %v1590_v1, %v2474_v58  ;;  %v1602_v63 = vpop.f32.mrb[2].mxu1  ;;  %v1209_v29 = vpop.f32.mrb[3].mxu0 }
 0x16c   : > { %v1333_v55 = vmax.f32 %v1317_v43, 0.0  ;;  %v1324_v23 = vmax.f32 %v1308_v14, 0.0  ;;  %v1296_v57 = vmul.f32 %v1602_v63, %v2474_v58  ;;  %v1287_v10 = vmul.f32 %v2474_v58, %v1209_v29  ;;  %v1249_v8 = vpop.f32.mrb[3].mxu1 }
 0x16d   : > { %1342 = vst.msk [vmem:[%s1816_s18 + $0x8] sm:$0xff] %vm1340_vm6, %v1325_v9  ;;  %v1332_v27 = vmax.f32 %v1316_v13, 0.0  ;;  %v1311_v37 = vadd.f32 %v2479_v18, %v1288_v19  ;;  %v1295_v41 = vmul.f32 %v2474_v58, %v1249_v8 }
 0x16e   : > { %1350 = vst.msk [vmem:[%s1816_s18 + $0x48] sm:$0xff] %vm1340_vm6, %v1333_v55  ;;  %1341 = vst.msk [vmem:[%s1816_s18] sm:$0xff] %vm1340_vm6, %v1324_v23  ;;  %v1319_v2 = vadd.f32 %v2479_v18, %v1296_v57  ;;  %v1310_v35 = vadd.f32 %v2479_v18, %v1287_v10  ;;  %v1593_v46 = vpop.f32.mrb[4].mxu0 }
 0x16f   : > { %1349 = vst.msk [vmem:[%s1816_s18 + $0x40] sm:$0xff] %vm1340_vm6, %v1332_v27  ;;  %v1327_v52 = vmax.f32 %v1311_v37, 0.0  ;;  %v1318_v0 = vadd.f32 %v2479_v18, %v1295_v41  ;;  %v1290_v11 = vmul.f32 %v1593_v46, %v2474_v58  ;;  %v1605_v33 = vpop.f32.mrb[4].mxu1  ;;  %v1219_v30 = vpop.f32.mrb[5].mxu0 }
 0x170   : > { %v1335_v53 = vmax.f32 %v1319_v2, 0.0  ;;  %v1326_v5 = vmax.f32 %v1310_v35, 0.0  ;;  %v1298_v56 = vmul.f32 %v1605_v33, %v2474_v58  ;;  %v1289_v62 = vmul.f32 %v2474_v58, %v1219_v30  ;;  %v1259_v6 = vpop.f32.mrb[5].mxu1 }
 0x171   : > { %1344 = vst.msk [vmem:[%s1816_s18 + $0x18] sm:$0xff] %vm1340_vm6, %v1327_v52  ;;  %v1334_v16 = vmax.f32 %v1318_v0, 0.0  ;;  %v1313_v42 = vadd.f32 %v2479_v18, %v1290_v11  ;;  %v1297_v21 = vmul.f32 %v2474_v58, %v1259_v6 }
 0x172   : > { %1352 = vst.msk [vmem:[%s1816_s18 + $0x58] sm:$0xff] %vm1340_vm6, %v1335_v53  ;;  %1343 = vst.msk [vmem:[%s1816_s18 + $0x10] sm:$0xff] %vm1340_vm6, %v1326_v5  ;;  %v1321_v34 = vadd.f32 %v2479_v18, %v1298_v56  ;;  %v1312_v49 = vadd.f32 %v2479_v18, %v1289_v62  ;;  %v1596_v4 = vpop.f32.mrb[6].mxu0 }
 0x173   : > { %1351 = vst.msk [vmem:[%s1816_s18 + $0x50] sm:$0xff] %vm1340_vm6, %v1334_v16  ;;  %v1329_v32 = vmax.f32 %v1313_v42, 0.0  ;;  %v1320_v15 = vadd.f32 %v2479_v18, %v1297_v21  ;;  %v1292_v28 = vmul.f32 %v1596_v4, %v2474_v58  ;;  %v1608_v54 = vpop.f32.mrb[6].mxu1  ;;  %v1229_v22 = vpop.f32.mrb[7].mxu0 }
 0x174   : > { %v1337_v31 = vmax.f32 %v1321_v34, 0.0  ;;  %v1328_v47 = vmax.f32 %v1312_v49, 0.0  ;;  %v1300_v17 = vmul.f32 %v1608_v54, %v2474_v58  ;;  %v1291_v20 = vmul.f32 %v2474_v58, %v1229_v22  ;;  %v1269_v25 = vpop.f32.mrb[7].mxu1 }
 0x175   : > { %1346 = vst.msk [vmem:[%s1816_s18 + $0x28] sm:$0xff] %vm1340_vm6, %v1329_v32  ;;  %v1336_v24 = vmax.f32 %v1320_v15, 0.0  ;;  %v1315_v51 = vadd.f32 %v2479_v18, %v1292_v28  ;;  %v1299_v12 = vmul.f32 %v2474_v58, %v1269_v25 }
 0x176   : > { %1354 = vst.msk [vmem:[%s1816_s18 + $0x68] sm:$0xff] %vm1340_vm6, %v1337_v31  ;;  %1345 = vst.msk [vmem:[%s1816_s18 + $0x20] sm:$0xff] %vm1340_vm6, %v1328_v47  ;;  %v1323_v60 = vadd.f32 %v2479_v18, %v1300_v17  ;;  %v1314_v50 = vadd.f32 %v2479_v18, %v1291_v20 }
 0x177   : > { %1353 = vst.msk [vmem:[%s1816_s18 + $0x60] sm:$0xff] %vm1340_vm6, %v1336_v24  ;;  %v1331_v61 = vmax.f32 %v1315_v51, 0.0  ;;  %v1322_v45 = vadd.f32 %v2479_v18, %v1299_v12 }
 0x178   : > { %v1339_v48 = vmax.f32 %v1323_v60, 0.0  ;;  %v1330_v40 = vmax.f32 %v1314_v50, 0.0 }
 0x179   : > { %1348 = vst.msk [vmem:[%s1816_s18 + $0x38] sm:$0xff] %vm1340_vm6, %v1331_v61  ;;  %v1338_v36 = vmax.f32 %v1322_v45, 0.0 }
 0x17a   : > { %1356 = vst.msk [vmem:[%s1816_s18 + $0x78] sm:$0xff] %vm1340_vm6, %v1339_v48  ;;  %1347 = vst.msk [vmem:[%s1816_s18 + $0x30] sm:$0xff] %vm1340_vm6, %v1330_v40 }
 0x17b   : > { %1355 = vst.msk [vmem:[%s1816_s18 + $0x70] sm:$0xff] %vm1340_vm6, %v1338_v36 }
 0x17c PF: > { %s18_s9 = sadd.s32 1, %s1689_s9   ;;  %s2642_s27 = smov %s1681_s29 }
 0x17d   : > { %p15_p12 = scmp.ge.s32.totalorder %s18_s9, 6   ;;  %s2643_s28 = smov %s1685_s30 }
 0x17e   : > { %s2644_s29 = smov %s2647_s10  ;;  %s2645_s30 = smov %s2651_s11 }
 0x17f   :  { %17 = sbr.rel (!%p15_p12) target bundleno = 3 (0x3), region = 98 }

</bundles_post_ra>
